<compile_context>
chip_gen: v7x
topology: tpu7x:2x2x1
jax: 0.10.0
libtpu: 0.0.40
codegen_flags: <defaults>
</compile_context>

<pallas_src>
import functools

import jax
import jax.numpy as jnp
from jax.experimental import pallas as pl
from jax.experimental.pallas import tpu as pltpu  # noqa: F401  (TPU backend)


def _fused_dual_lstm_fc_kernel(xfw_ref, xbw_ref, wih_ref, whh_ref, b_ref,
                               wfcb_ref, bfcb_ref, h_out_ref, logit_out_ref,
                               *, B, T, H):
    """Both LSTM branches + FC in a single kernel invocation.

    Shapes (whole arrays resident in VMEM, no grid):
      xfw_ref/xbw_ref: (T*B, D)      time-major inputs (t-major, b-minor rows)
      wih_ref:         (2, D, 4H)    W_ih^T per branch
      whh_ref:         (2, H, 4H)    W_hh^T per branch
      b_ref:           (2, 1, 4H)    b_ih + b_hh per branch
      wfcb_ref:        (2, T*H, T*A) kron(I_T, W_fc^T) per branch
      bfcb_ref:        (2, 1, T*A)   tiled FC bias per branch
      h_out_ref:       (2, B, T*H)   lane-dense hidden slabs
      logit_out_ref:   (2, B, T*A)   lane-dense logit slabs
    """
    f32 = jnp.float32

    wih_f, wih_b = wih_ref[0], wih_ref[1]          # (D, 4H)
    whh_f, whh_b = whh_ref[0], whh_ref[1]          # (H, 4H)
    bias_f, bias_b = b_ref[0], b_ref[1]            # (1, 4H)

    # (2) Whole-sequence input->gate projection: ONE matmul per branch,
    #     off the serial recurrence chain.
    xg_f = jnp.dot(xfw_ref[...], wih_f, preferred_element_type=f32) + bias_f
    xg_b = jnp.dot(xbw_ref[...], wih_b, preferred_element_type=f32) + bias_b

    h_f = jnp.zeros((B, H), f32)
    c_f = jnp.zeros((B, H), f32)
    h_b = jnp.zeros((B, H), f32)
    c_b = jnp.zeros((B, H), f32)
    hs_f = []
    hs_b = []

    def lstm_step(xg_t, h, c, whh):
        # Only the small (B,H)x(H,4H) matmul + nonlinearities stay on the
        # serial chain.
        gates = xg_t + jnp.dot(h, whh, preferred_element_type=f32)   # (B, 4H)
        # (6) one sigmoid over the full 4H-lane vreg, one tanh on the g block.
        sg = jax.nn.sigmoid(gates)
        g_g = jnp.tanh(gates[:, 2 * H:3 * H])
        i_g = sg[:, 0 * H:1 * H]
        f_g = sg[:, 1 * H:2 * H]
        o_g = sg[:, 3 * H:4 * H]
        c_new = f_g * c + i_g * g_g
        h_new = o_g * jnp.tanh(c_new)
        return h_new, c_new

    # (1) Fully unrolled recurrence; fw and bw chains are independent, so
    #     emitting both in the same iteration lets the LLO scheduler hide
    #     each chain's MXU/EUP latency behind the other.
    for t in range(T):
        xslice_f = xg_f[t * B:(t + 1) * B, :]      # static sublane slice
        xslice_b = xg_b[t * B:(t + 1) * B, :]
        h_f, c_f = lstm_step(xslice_f, h_f, c_f, whh_f)
        h_b, c_b = lstm_step(xslice_b, h_b, c_b, whh_b)
        hs_f.append(h_f)
        hs_b.append(h_b)

    # (3) Lane-dense hidden slabs (B, T*H) written once per branch.
    hlane_f = jnp.concatenate(hs_f, axis=1)        # (B, T*H)
    hlane_b = jnp.concatenate(hs_b, axis=1)
    h_out_ref[0] = hlane_f.astype(h_out_ref.dtype)
    h_out_ref[1] = hlane_b.astype(h_out_ref.dtype)

    # (4) One FC matmul per branch against kron(I_T, W_fc^T): directly
    #     produces the lane-dense (B, T*A) logit slab.
    logit_out_ref[0] = (
        jnp.dot(hlane_f, wfcb_ref[0], preferred_element_type=f32)
        + bfcb_ref[0]).astype(logit_out_ref.dtype)
    logit_out_ref[1] = (
        jnp.dot(hlane_b, wfcb_ref[1], preferred_element_type=f32)
        + bfcb_ref[1]).astype(logit_out_ref.dtype)


def prepare_params(params, seq_len):
    """One-time weight preparation (hoisted out of the per-call path)."""
    f32 = jnp.float32
    T = seq_len
    H = params["w_hh_fw"].shape[1]
    A = params["w_fc_fw"].shape[0]
    eye_t = jnp.eye(T, dtype=f32)

    def prep(sfx):
        wih = params[f"w_ih_{sfx}"].astype(f32).T                       # (D,4H)
        whh = params[f"w_hh_{sfx}"].astype(f32).T                       # (H,4H)
        b = (params[f"b_ih_{sfx}"] +
             params[f"b_hh_{sfx}"]).astype(f32).reshape(1, 4 * H)       # (1,4H)
        # Block-diagonal FC weight: (T*H, T*A), block (t,t) = W_fc^T.
        wfc_big = jnp.kron(eye_t, params[f"w_fc_{sfx}"].astype(f32).T)
        bfc_big = jnp.tile(params[f"b_fc_{sfx}"].astype(f32).reshape(1, A),
                           (1, T))                                      # (1,T*A)
        return wih, whh, b, wfc_big, bfc_big

    wih_f, whh_f, b_f, wfcb_f, bfcb_f = prep("fw")
    wih_b, whh_b, b_b, wfcb_b, bfcb_b = prep("bw")
    return {
        "wih": jnp.stack([wih_f, wih_b]),          # (2, D, 4H)
        "whh": jnp.stack([whh_f, whh_b]),          # (2, H, 4H)
        "b": jnp.stack([b_f, b_b]),                # (2, 1, 4H)
        "wfc_big": jnp.stack([wfcb_f, wfcb_b]),    # (2, T*H, T*A)
        "bfc_big": jnp.stack([bfcb_f, bfcb_b]),    # (2, 1, T*A)
    }


def temporal_proposal_forward(prepped, data_fw, data_bw):
    """Returns (logit_fw, logit_bw, fw_hidden, bw_hidden) like PyTorch."""
    B, T, D = data_fw.shape
    H = prepped["whh"].shape[1]
    A = prepped["bfc_big"].shape[-1] // T
    f32 = jnp.float32

    # Time-major (T*B, D) so that per-timestep gate slices inside the kernel
    # are contiguous static sublane slices.  (Only the tiny data tensors are
    # reshaped per call; all weight prep lives in prepare_params.)
    x_f = jnp.transpose(data_fw, (1, 0, 2)).reshape(T * B, D).astype(f32)
    x_b = jnp.transpose(data_bw, (1, 0, 2)).reshape(T * B, D).astype(f32)

    kernel = functools.partial(_fused_dual_lstm_fc_kernel, B=B, T=T, H=H)

    h_out, logit_out = pl.pallas_call(
        kernel,
        out_shape=(
            jax.ShapeDtypeStruct((2, B, T * H), f32),   # lane-dense hidden
            jax.ShapeDtypeStruct((2, B, T * A), f32),   # lane-dense logits
        ),
    )(x_f, x_b, prepped["wih"], prepped["whh"], prepped["b"],
      prepped["wfc_big"], prepped["bfc_big"])

    # Lane-dense slabs -> PyTorch layout with free contiguous reshapes only.
    fw_hidden = h_out[0].reshape(B, T, H).reshape(B * T, H)
    bw_hidden = h_out[1].reshape(B, T, H).reshape(B * T, H)
    logit_fw = logit_out[0].reshape(B, T, A).reshape(B * T, A)
    logit_bw = logit_out[1].reshape(B, T, A).reshape(B * T, A)
    return logit_fw, logit_bw, fw_hidden, bw_hidden


# ---------------------------------------------------------------------------
# Pure-JAX reference (lax.scan LSTM) for correctness checking.
# ---------------------------------------------------------------------------
def _lstm_fc_ref(data_btD, w_ih, w_hh, b_ih, b_hh, w_fc, b_fc):
    B, T, D = data_btD.shape
    H = w_hh.shape[1]

    def step(carry, x_t):
        h, c = carry
        gates = x_t @ w_ih.T + h @ w_hh.T + b_ih + b_hh
        i_g = jax.nn.sigmoid(gates[:, 0 * H:1 * H])
        f_g = jax.nn.sigmoid(gates[:, 1 * H:2 * H])
        g_g = jnp.tanh(gates[:, 2 * H:3 * H])
        o_g = jax.nn.sigmoid(gates[:, 3 * H:4 * H])
        c_new = f_g * c + i_g * g_g
        h_new = o_g * jnp.tanh(c_new)
        return (h_new, c_new), h_new

    x_tbd = jnp.transpose(data_btD, (1, 0, 2))
    h0 = jnp.zeros((B, H), jnp.float32)
    (_, _), hs = jax.lax.scan(step, (h0, h0), x_tbd)          # (T, B, H)
    hidden = jnp.transpose(hs, (1, 0, 2)).reshape(B * T, H)
    logits = hidden @ w_fc.T + b_fc
    return logits, hidden


def _init_params(key, D, H, A):
    keys = jax.random.split(key, 12)
    s = 1.0 / jnp.sqrt(H)
    u = lambda k, shape: jax.random.uniform(k, shape, jnp.float32, -s, s)
    return {
        "w_ih_fw": u(keys[0], (4 * H, D)), "w_hh_fw": u(keys[1], (4 * H, H)),
        "b_ih_fw": u(keys[2], (4 * H,)),   "b_hh_fw": u(keys[3], (4 * H,)),
        "w_ih_bw": u(keys[4], (4 * H, D)), "w_hh_bw": u(keys[5], (4 * H, H)),
        "b_ih_bw": u(keys[6], (4 * H,)),   "b_hh_bw": u(keys[7], (4 * H,)),
        "w_fc_fw": u(keys[8], (A, H)),     "b_fc_fw": u(keys[9], (A,)),
        "w_fc_bw": u(keys[10], (A, H)),    "b_fc_bw": u(keys[11], (A,)),
    }


if __name__ == "__main__":
    # options: video_feat_dim=32, encoded_video_feat_dim=32, num_anchors=16,
    #          batch_size=2, seq_len=8
    B, T, D, H, A = 2, 8, 32, 32, 16

    key = jax.random.PRNGKey(0)
    k_params, k_fw, k_bw = jax.random.split(key, 3)
    params = _init_params(k_params, D, H, A)

    data_fw = jax.random.normal(k_fw, (B, T, D), jnp.float32)
    data_bw = jax.random.normal(k_bw, (B, T, D), jnp.float32)

    # Weight preparation done ONCE, outside the per-call path.
    prepped = jax.tree_util.tree_map(jax.block_until_ready,
                                     prepare_params(params, seq_len=T))

    fwd = jax.jit(temporal_proposal_forward)
    logit_fw, logit_bw, fw_out, bw_out = jax.block_until_ready(
        fwd(prepped, data_fw, data_bw))

    assert logit_fw.shape == (B * T, A) and logit_bw.shape == (B * T, A)
    assert fw_out.shape == (B * T, H) and bw_out.shape == (B * T, H)

    # Correctness check of BOTH branches.
    ref_logit_fw, ref_fw = _lstm_fc_ref(
        data_fw, params["w_ih_fw"], params["w_hh_fw"],
        params["b_ih_fw"], params["b_hh_fw"],
        params["w_fc_fw"], params["b_fc_fw"])
    ref_logit_bw, ref_bw = _lstm_fc_ref(
        data_bw, params["w_ih_bw"], params["w_hh_bw"],
        params["b_ih_bw"], params["b_hh_bw"],
        params["w_fc_bw"], params["b_fc_bw"])

    tol = dict(atol=1e-4, rtol=1e-4)
    assert jnp.allclose(fw_out, ref_fw, **tol)
    assert jnp.allclose(bw_out, ref_bw, **tol)
    assert jnp.allclose(logit_fw, ref_logit_fw, **tol)
    assert jnp.allclose(logit_bw, ref_logit_bw, **tol)

    print("KERNEL_OK")
</pallas_src>

<mosaic_0001>
module attributes {stable_mosaic.version = 11 : i64} {
  func.func @_fused_dual_lstm_fc_kernel(%arg0: memref<16x32xf32, #tpu.memory_space<vmem>>, %arg1: memref<16x32xf32, #tpu.memory_space<vmem>>, %arg2: memref<2x32x128xf32, #tpu.memory_space<vmem>>, %arg3: memref<2x32x128xf32, #tpu.memory_space<vmem>>, %arg4: memref<2x1x128xf32, #tpu.memory_space<vmem>>, %arg5: memref<2x256x128xf32, #tpu.memory_space<vmem>>, %arg6: memref<2x1x128xf32, #tpu.memory_space<vmem>>, %arg7: memref<2x2x256xf32, #tpu.memory_space<vmem>>, %arg8: memref<2x2x128xf32, #tpu.memory_space<vmem>>) attributes {dimension_semantics = [], scalar_prefetch = 0 : i64, scratch_operands = 0 : i64, tpu.core_type = #tpu.core_type<tc>} {
    %c0 = arith.constant 0 : index
    %c0_0 = arith.constant 0 : index
    %c0_1 = arith.constant 0 : index
    %0 = vector.load %arg2[%c0, %c0_0, %c0_1] : memref<2x32x128xf32, #tpu.memory_space<vmem>>, vector<1x32x128xf32>
    %1 = vector.shape_cast %0 : vector<1x32x128xf32> to vector<32x128xf32>
    %c1 = arith.constant 1 : index
    %c0_2 = arith.constant 0 : index
    %c0_3 = arith.constant 0 : index
    %2 = vector.load %arg2[%c1, %c0_2, %c0_3] : memref<2x32x128xf32, #tpu.memory_space<vmem>>, vector<1x32x128xf32>
    %3 = vector.shape_cast %2 : vector<1x32x128xf32> to vector<32x128xf32>
    %c0_4 = arith.constant 0 : index
    %c0_5 = arith.constant 0 : index
    %c0_6 = arith.constant 0 : index
    %4 = vector.load %arg3[%c0_4, %c0_5, %c0_6] : memref<2x32x128xf32, #tpu.memory_space<vmem>>, vector<1x32x128xf32>
    %5 = vector.shape_cast %4 : vector<1x32x128xf32> to vector<32x128xf32>
    %c1_7 = arith.constant 1 : index
    %c0_8 = arith.constant 0 : index
    %c0_9 = arith.constant 0 : index
    %6 = vector.load %arg3[%c1_7, %c0_8, %c0_9] : memref<2x32x128xf32, #tpu.memory_space<vmem>>, vector<1x32x128xf32>
    %7 = vector.shape_cast %6 : vector<1x32x128xf32> to vector<32x128xf32>
    %c0_10 = arith.constant 0 : index
    %c0_11 = arith.constant 0 : index
    %c0_12 = arith.constant 0 : index
    %8 = vector.load %arg4[%c0_10, %c0_11, %c0_12] : memref<2x1x128xf32, #tpu.memory_space<vmem>>, vector<1x1x128xf32>
    %9 = vector.shape_cast %8 : vector<1x1x128xf32> to vector<1x128xf32>
    %c1_13 = arith.constant 1 : index
    %c0_14 = arith.constant 0 : index
    %c0_15 = arith.constant 0 : index
    %10 = vector.load %arg4[%c1_13, %c0_14, %c0_15] : memref<2x1x128xf32, #tpu.memory_space<vmem>>, vector<1x1x128xf32>
    %11 = vector.shape_cast %10 : vector<1x1x128xf32> to vector<1x128xf32>
    %c0_16 = arith.constant 0 : index
    %c0_17 = arith.constant 0 : index
    %12 = vector.load %arg0[%c0_16, %c0_17] : memref<16x32xf32, #tpu.memory_space<vmem>>, vector<16x32xf32>
    %cst = arith.constant dense<0.000000e+00> : vector<16x128xf32>
    %13 = tpu.matmul %12, %1, %cst {dimension_numbers = #tpu.dot_dimension_numbers<[1], [0], [0], [1], [0, 0, 1, 1], [], []>} : vector<16x32xf32>, vector<32x128xf32>, vector<16x128xf32> -> vector<16x128xf32>
    %14 = vector.broadcast %9 : vector<1x128xf32> to vector<16x128xf32>
    %15 = arith.addf %13, %14 : vector<16x128xf32>
    %c0_18 = arith.constant 0 : index
    %c0_19 = arith.constant 0 : index
    %16 = vector.load %arg1[%c0_18, %c0_19] : memref<16x32xf32, #tpu.memory_space<vmem>>, vector<16x32xf32>
    %cst_20 = arith.constant dense<0.000000e+00> : vector<16x128xf32>
    %17 = tpu.matmul %16, %3, %cst_20 {dimension_numbers = #tpu.dot_dimension_numbers<[1], [0], [0], [1], [0, 0, 1, 1], [], []>} : vector<16x32xf32>, vector<32x128xf32>, vector<16x128xf32> -> vector<16x128xf32>
    %18 = vector.broadcast %11 : vector<1x128xf32> to vector<16x128xf32>
    %19 = arith.addf %17, %18 : vector<16x128xf32>
    %cst_21 = arith.constant 0.000000e+00 : f32
    %20 = vector.broadcast %cst_21 : f32 to vector<2x32xf32>
    %cst_22 = arith.constant 0.000000e+00 : f32
    %21 = vector.broadcast %cst_22 : f32 to vector<2x32xf32>
    %cst_23 = arith.constant 0.000000e+00 : f32
    %22 = vector.broadcast %cst_23 : f32 to vector<2x32xf32>
    %cst_24 = arith.constant 0.000000e+00 : f32
    %23 = vector.broadcast %cst_24 : f32 to vector<2x32xf32>
    %24 = vector.extract_strided_slice %15 {offsets = [0, 0], sizes = [2, 128], strides = [1, 1]} : vector<16x128xf32> to vector<2x128xf32>
    %25 = vector.extract_strided_slice %19 {offsets = [0, 0], sizes = [2, 128], strides = [1, 1]} : vector<16x128xf32> to vector<2x128xf32>
    %cst_25 = arith.constant dense<0.000000e+00> : vector<2x128xf32>
    %26 = tpu.matmul %20, %5, %cst_25 {dimension_numbers = #tpu.dot_dimension_numbers<[1], [0], [0], [1], [0, 0, 1, 1], [], []>} : vector<2x32xf32>, vector<32x128xf32>, vector<2x128xf32> -> vector<2x128xf32>
    %27 = arith.addf %24, %26 : vector<2x128xf32>
    %28 = arith.negf %27 : vector<2x128xf32>
    %29 = math.exp %28 : vector<2x128xf32>
    %cst_26 = arith.constant 1.000000e+00 : f32
    %30 = vector.broadcast %cst_26 : f32 to vector<2x128xf32>
    %31 = arith.addf %30, %29 : vector<2x128xf32>
    %32 = arith.divf %30, %31 : vector<2x128xf32>
    %33 = vector.extract_strided_slice %27 {offsets = [0, 64], sizes = [2, 32], strides = [1, 1]} : vector<2x128xf32> to vector<2x32xf32>
    %34 = math.tanh %33 : vector<2x32xf32>
    %35 = vector.extract_strided_slice %32 {offsets = [0, 0], sizes = [2, 32], strides = [1, 1]} : vector<2x128xf32> to vector<2x32xf32>
    %36 = vector.extract_strided_slice %32 {offsets = [0, 32], sizes = [2, 32], strides = [1, 1]} : vector<2x128xf32> to vector<2x32xf32>
    %37 = vector.extract_strided_slice %32 {offsets = [0, 96], sizes = [2, 32], strides = [1, 1]} : vector<2x128xf32> to vector<2x32xf32>
    %38 = arith.mulf %36, %21 : vector<2x32xf32>
    %39 = arith.mulf %35, %34 : vector<2x32xf32>
    %40 = arith.addf %38, %39 : vector<2x32xf32>
    %41 = math.tanh %40 : vector<2x32xf32>
    %42 = arith.mulf %37, %41 : vector<2x32xf32>
    %cst_27 = arith.constant dense<0.000000e+00> : vector<2x128xf32>
    %43 = tpu.matmul %22, %7, %cst_27 {dimension_numbers = #tpu.dot_dimension_numbers<[1], [0], [0], [1], [0, 0, 1, 1], [], []>} : vector<2x32xf32>, vector<32x128xf32>, vector<2x128xf32> -> vector<2x128xf32>
    %44 = arith.addf %25, %43 : vector<2x128xf32>
    %45 = arith.negf %44 : vector<2x128xf32>
    %46 = math.exp %45 : vector<2x128xf32>
    %cst_28 = arith.constant 1.000000e+00 : f32
    %47 = vector.broadcast %cst_28 : f32 to vector<2x128xf32>
    %48 = arith.addf %47, %46 : vector<2x128xf32>
    %49 = arith.divf %47, %48 : vector<2x128xf32>
    %50 = vector.extract_strided_slice %44 {offsets = [0, 64], sizes = [2, 32], strides = [1, 1]} : vector<2x128xf32> to vector<2x32xf32>
    %51 = math.tanh %50 : vector<2x32xf32>
    %52 = vector.extract_strided_slice %49 {offsets = [0, 0], sizes = [2, 32], strides = [1, 1]} : vector<2x128xf32> to vector<2x32xf32>
    %53 = vector.extract_strided_slice %49 {offsets = [0, 32], sizes = [2, 32], strides = [1, 1]} : vector<2x128xf32> to vector<2x32xf32>
    %54 = vector.extract_strided_slice %49 {offsets = [0, 96], sizes = [2, 32], strides = [1, 1]} : vector<2x128xf32> to vector<2x32xf32>
    %55 = arith.mulf %53, %23 : vector<2x32xf32>
    %56 = arith.mulf %52, %51 : vector<2x32xf32>
    %57 = arith.addf %55, %56 : vector<2x32xf32>
    %58 = math.tanh %57 : vector<2x32xf32>
    %59 = arith.mulf %54, %58 : vector<2x32xf32>
    %60 = vector.extract_strided_slice %15 {offsets = [2, 0], sizes = [2, 128], strides = [1, 1]} : vector<16x128xf32> to vector<2x128xf32>
    %61 = vector.extract_strided_slice %19 {offsets = [2, 0], sizes = [2, 128], strides = [1, 1]} : vector<16x128xf32> to vector<2x128xf32>
    %cst_29 = arith.constant dense<0.000000e+00> : vector<2x128xf32>
    %62 = tpu.matmul %42, %5, %cst_29 {dimension_numbers = #tpu.dot_dimension_numbers<[1], [0], [0], [1], [0, 0, 1, 1], [], []>} : vector<2x32xf32>, vector<32x128xf32>, vector<2x128xf32> -> vector<2x128xf32>
    %63 = arith.addf %60, %62 : vector<2x128xf32>
    %64 = arith.negf %63 : vector<2x128xf32>
    %65 = math.exp %64 : vector<2x128xf32>
    %cst_30 = arith.constant 1.000000e+00 : f32
    %66 = vector.broadcast %cst_30 : f32 to vector<2x128xf32>
    %67 = arith.addf %66, %65 : vector<2x128xf32>
    %68 = arith.divf %66, %67 : vector<2x128xf32>
    %69 = vector.extract_strided_slice %63 {offsets = [0, 64], sizes = [2, 32], strides = [1, 1]} : vector<2x128xf32> to vector<2x32xf32>
    %70 = math.tanh %69 : vector<2x32xf32>
    %71 = vector.extract_strided_slice %68 {offsets = [0, 0], sizes = [2, 32], strides = [1, 1]} : vector<2x128xf32> to vector<2x32xf32>
    %72 = vector.extract_strided_slice %68 {offsets = [0, 32], sizes = [2, 32], strides = [1, 1]} : vector<2x128xf32> to vector<2x32xf32>
    %73 = vector.extract_strided_slice %68 {offsets = [0, 96], sizes = [2, 32], strides = [1, 1]} : vector<2x128xf32> to vector<2x32xf32>
    %74 = arith.mulf %72, %40 : vector<2x32xf32>
    %75 = arith.mulf %71, %70 : vector<2x32xf32>
    %76 = arith.addf %74, %75 : vector<2x32xf32>
    %77 = math.tanh %76 : vector<2x32xf32>
    %78 = arith.mulf %73, %77 : vector<2x32xf32>
    %cst_31 = arith.constant dense<0.000000e+00> : vector<2x128xf32>
    %79 = tpu.matmul %59, %7, %cst_31 {dimension_numbers = #tpu.dot_dimension_numbers<[1], [0], [0], [1], [0, 0, 1, 1], [], []>} : vector<2x32xf32>, vector<32x128xf32>, vector<2x128xf32> -> vector<2x128xf32>
    %80 = arith.addf %61, %79 : vector<2x128xf32>
    %81 = arith.negf %80 : vector<2x128xf32>
    %82 = math.exp %81 : vector<2x128xf32>
    %cst_32 = arith.constant 1.000000e+00 : f32
    %83 = vector.broadcast %cst_32 : f32 to vector<2x128xf32>
    %84 = arith.addf %83, %82 : vector<2x128xf32>
    %85 = arith.divf %83, %84 : vector<2x128xf32>
    %86 = vector.extract_strided_slice %80 {offsets = [0, 64], sizes = [2, 32], strides = [1, 1]} : vector<2x128xf32> to vector<2x32xf32>
    %87 = math.tanh %86 : vector<2x32xf32>
    %88 = vector.extract_strided_slice %85 {offsets = [0, 0], sizes = [2, 32], strides = [1, 1]} : vector<2x128xf32> to vector<2x32xf32>
    %89 = vector.extract_strided_slice %85 {offsets = [0, 32], sizes = [2, 32], strides = [1, 1]} : vector<2x128xf32> to vector<2x32xf32>
    %90 = vector.extract_strided_slice %85 {offsets = [0, 96], sizes = [2, 32], strides = [1, 1]} : vector<2x128xf32> to vector<2x32xf32>
    %91 = arith.mulf %89, %57 : vector<2x32xf32>
    %92 = arith.mulf %88, %87 : vector<2x32xf32>
    %93 = arith.addf %91, %92 : vector<2x32xf32>
    %94 = math.tanh %93 : vector<2x32xf32>
    %95 = arith.mulf %90, %94 : vector<2x32xf32>
    %96 = vector.extract_strided_slice %15 {offsets = [4, 0], sizes = [2, 128], strides = [1, 1]} : vector<16x128xf32> to vector<2x128xf32>
    %97 = vector.extract_strided_slice %19 {offsets = [4, 0], sizes = [2, 128], strides = [1, 1]} : vector<16x128xf32> to vector<2x128xf32>
    %cst_33 = arith.constant dense<0.000000e+00> : vector<2x128xf32>
    %98 = tpu.matmul %78, %5, %cst_33 {dimension_numbers = #tpu.dot_dimension_numbers<[1], [0], [0], [1], [0, 0, 1, 1], [], []>} : vector<2x32xf32>, vector<32x128xf32>, vector<2x128xf32> -> vector<2x128xf32>
    %99 = arith.addf %96, %98 : vector<2x128xf32>
    %100 = arith.negf %99 : vector<2x128xf32>
    %101 = math.exp %100 : vector<2x128xf32>
    %cst_34 = arith.constant 1.000000e+00 : f32
    %102 = vector.broadcast %cst_34 : f32 to vector<2x128xf32>
    %103 = arith.addf %102, %101 : vector<2x128xf32>
    %104 = arith.divf %102, %103 : vector<2x128xf32>
    %105 = vector.extract_strided_slice %99 {offsets = [0, 64], sizes = [2, 32], strides = [1, 1]} : vector<2x128xf32> to vector<2x32xf32>
    %106 = math.tanh %105 : vector<2x32xf32>
    %107 = vector.extract_strided_slice %104 {offsets = [0, 0], sizes = [2, 32], strides = [1, 1]} : vector<2x128xf32> to vector<2x32xf32>
    %108 = vector.extract_strided_slice %104 {offsets = [0, 32], sizes = [2, 32], strides = [1, 1]} : vector<2x128xf32> to vector<2x32xf32>
    %109 = vector.extract_strided_slice %104 {offsets = [0, 96], sizes = [2, 32], strides = [1, 1]} : vector<2x128xf32> to vector<2x32xf32>
    %110 = arith.mulf %108, %76 : vector<2x32xf32>
    %111 = arith.mulf %107, %106 : vector<2x32xf32>
    %112 = arith.addf %110, %111 : vector<2x32xf32>
    %113 = math.tanh %112 : vector<2x32xf32>
    %114 = arith.mulf %109, %113 : vector<2x32xf32>
    %cst_35 = arith.constant dense<0.000000e+00> : vector<2x128xf32>
    %115 = tpu.matmul %95, %7, %cst_35 {dimension_numbers = #tpu.dot_dimension_numbers<[1], [0], [0], [1], [0, 0, 1, 1], [], []>} : vector<2x32xf32>, vector<32x128xf32>, vector<2x128xf32> -> vector<2x128xf32>
    %116 = arith.addf %97, %115 : vector<2x128xf32>
    %117 = arith.negf %116 : vector<2x128xf32>
    %118 = math.exp %117 : vector<2x128xf32>
    %cst_36 = arith.constant 1.000000e+00 : f32
    %119 = vector.broadcast %cst_36 : f32 to vector<2x128xf32>
    %120 = arith.addf %119, %118 : vector<2x128xf32>
    %121 = arith.divf %119, %120 : vector<2x128xf32>
    %122 = vector.extract_strided_slice %116 {offsets = [0, 64], sizes = [2, 32], strides = [1, 1]} : vector<2x128xf32> to vector<2x32xf32>
    %123 = math.tanh %122 : vector<2x32xf32>
    %124 = vector.extract_strided_slice %121 {offsets = [0, 0], sizes = [2, 32], strides = [1, 1]} : vector<2x128xf32> to vector<2x32xf32>
    %125 = vector.extract_strided_slice %121 {offsets = [0, 32], sizes = [2, 32], strides = [1, 1]} : vector<2x128xf32> to vector<2x32xf32>
    %126 = vector.extract_strided_slice %121 {offsets = [0, 96], sizes = [2, 32], strides = [1, 1]} : vector<2x128xf32> to vector<2x32xf32>
    %127 = arith.mulf %125, %93 : vector<2x32xf32>
    %128 = arith.mulf %124, %123 : vector<2x32xf32>
    %129 = arith.addf %127, %128 : vector<2x32xf32>
    %130 = math.tanh %129 : vector<2x32xf32>
    %131 = arith.mulf %126, %130 : vector<2x32xf32>
    %132 = vector.extract_strided_slice %15 {offsets = [6, 0], sizes = [2, 128], strides = [1, 1]} : vector<16x128xf32> to vector<2x128xf32>
    %133 = vector.extract_strided_slice %19 {offsets = [6, 0], sizes = [2, 128], strides = [1, 1]} : vector<16x128xf32> to vector<2x128xf32>
    %cst_37 = arith.constant dense<0.000000e+00> : vector<2x128xf32>
    %134 = tpu.matmul %114, %5, %cst_37 {dimension_numbers = #tpu.dot_dimension_numbers<[1], [0], [0], [1], [0, 0, 1, 1], [], []>} : vector<2x32xf32>, vector<32x128xf32>, vector<2x128xf32> -> vector<2x128xf32>
    %135 = arith.addf %132, %134 : vector<2x128xf32>
    %136 = arith.negf %135 : vector<2x128xf32>
    %137 = math.exp %136 : vector<2x128xf32>
    %cst_38 = arith.constant 1.000000e+00 : f32
    %138 = vector.broadcast %cst_38 : f32 to vector<2x128xf32>
    %139 = arith.addf %138, %137 : vector<2x128xf32>
    %140 = arith.divf %138, %139 : vector<2x128xf32>
    %141 = vector.extract_strided_slice %135 {offsets = [0, 64], sizes = [2, 32], strides = [1, 1]} : vector<2x128xf32> to vector<2x32xf32>
    %142 = math.tanh %141 : vector<2x32xf32>
    %143 = vector.extract_strided_slice %140 {offsets = [0, 0], sizes = [2, 32], strides = [1, 1]} : vector<2x128xf32> to vector<2x32xf32>
    %144 = vector.extract_strided_slice %140 {offsets = [0, 32], sizes = [2, 32], strides = [1, 1]} : vector<2x128xf32> to vector<2x32xf32>
    %145 = vector.extract_strided_slice %140 {offsets = [0, 96], sizes = [2, 32], strides = [1, 1]} : vector<2x128xf32> to vector<2x32xf32>
    %146 = arith.mulf %144, %112 : vector<2x32xf32>
    %147 = arith.mulf %143, %142 : vector<2x32xf32>
    %148 = arith.addf %146, %147 : vector<2x32xf32>
    %149 = math.tanh %148 : vector<2x32xf32>
    %150 = arith.mulf %145, %149 : vector<2x32xf32>
    %cst_39 = arith.constant dense<0.000000e+00> : vector<2x128xf32>
    %151 = tpu.matmul %131, %7, %cst_39 {dimension_numbers = #tpu.dot_dimension_numbers<[1], [0], [0], [1], [0, 0, 1, 1], [], []>} : vector<2x32xf32>, vector<32x128xf32>, vector<2x128xf32> -> vector<2x128xf32>
    %152 = arith.addf %133, %151 : vector<2x128xf32>
    %153 = arith.negf %152 : vector<2x128xf32>
    %154 = math.exp %153 : vector<2x128xf32>
    %cst_40 = arith.constant 1.000000e+00 : f32
    %155 = vector.broadcast %cst_40 : f32 to vector<2x128xf32>
    %156 = arith.addf %155, %154 : vector<2x128xf32>
    %157 = arith.divf %155, %156 : vector<2x128xf32>
    %158 = vector.extract_strided_slice %152 {offsets = [0, 64], sizes = [2, 32], strides = [1, 1]} : vector<2x128xf32> to vector<2x32xf32>
    %159 = math.tanh %158 : vector<2x32xf32>
    %160 = vector.extract_strided_slice %157 {offsets = [0, 0], sizes = [2, 32], strides = [1, 1]} : vector<2x128xf32> to vector<2x32xf32>
    %161 = vector.extract_strided_slice %157 {offsets = [0, 32], sizes = [2, 32], strides = [1, 1]} : vector<2x128xf32> to vector<2x32xf32>
    %162 = vector.extract_strided_slice %157 {offsets = [0, 96], sizes = [2, 32], strides = [1, 1]} : vector<2x128xf32> to vector<2x32xf32>
    %163 = arith.mulf %161, %129 : vector<2x32xf32>
    %164 = arith.mulf %160, %159 : vector<2x32xf32>
    %165 = arith.addf %163, %164 : vector<2x32xf32>
    %166 = math.tanh %165 : vector<2x32xf32>
    %167 = arith.mulf %162, %166 : vector<2x32xf32>
    %168 = vector.extract_strided_slice %15 {offsets = [8, 0], sizes = [2, 128], strides = [1, 1]} : vector<16x128xf32> to vector<2x128xf32>
    %169 = vector.extract_strided_slice %19 {offsets = [8, 0], sizes = [2, 128], strides = [1, 1]} : vector<16x128xf32> to vector<2x128xf32>
    %cst_41 = arith.constant dense<0.000000e+00> : vector<2x128xf32>
    %170 = tpu.matmul %150, %5, %cst_41 {dimension_numbers = #tpu.dot_dimension_numbers<[1], [0], [0], [1], [0, 0, 1, 1], [], []>} : vector<2x32xf32>, vector<32x128xf32>, vector<2x128xf32> -> vector<2x128xf32>
    %171 = arith.addf %168, %170 : vector<2x128xf32>
    %172 = arith.negf %171 : vector<2x128xf32>
    %173 = math.exp %172 : vector<2x128xf32>
    %cst_42 = arith.constant 1.000000e+00 : f32
    %174 = vector.broadcast %cst_42 : f32 to vector<2x128xf32>
    %175 = arith.addf %174, %173 : vector<2x128xf32>
    %176 = arith.divf %174, %175 : vector<2x128xf32>
    %177 = vector.extract_strided_slice %171 {offsets = [0, 64], sizes = [2, 32], strides = [1, 1]} : vector<2x128xf32> to vector<2x32xf32>
    %178 = math.tanh %177 : vector<2x32xf32>
    %179 = vector.extract_strided_slice %176 {offsets = [0, 0], sizes = [2, 32], strides = [1, 1]} : vector<2x128xf32> to vector<2x32xf32>
    %180 = vector.extract_strided_slice %176 {offsets = [0, 32], sizes = [2, 32], strides = [1, 1]} : vector<2x128xf32> to vector<2x32xf32>
    %181 = vector.extract_strided_slice %176 {offsets = [0, 96], sizes = [2, 32], strides = [1, 1]} : vector<2x128xf32> to vector<2x32xf32>
    %182 = arith.mulf %180, %148 : vector<2x32xf32>
    %183 = arith.mulf %179, %178 : vector<2x32xf32>
    %184 = arith.addf %182, %183 : vector<2x32xf32>
    %185 = math.tanh %184 : vector<2x32xf32>
    %186 = arith.mulf %181, %185 : vector<2x32xf32>
    %cst_43 = arith.constant dense<0.000000e+00> : vector<2x128xf32>
    %187 = tpu.matmul %167, %7, %cst_43 {dimension_numbers = #tpu.dot_dimension_numbers<[1], [0], [0], [1], [0, 0, 1, 1], [], []>} : vector<2x32xf32>, vector<32x128xf32>, vector<2x128xf32> -> vector<2x128xf32>
    %188 = arith.addf %169, %187 : vector<2x128xf32>
    %189 = arith.negf %188 : vector<2x128xf32>
    %190 = math.exp %189 : vector<2x128xf32>
    %cst_44 = arith.constant 1.000000e+00 : f32
    %191 = vector.broadcast %cst_44 : f32 to vector<2x128xf32>
    %192 = arith.addf %191, %190 : vector<2x128xf32>
    %193 = arith.divf %191, %192 : vector<2x128xf32>
    %194 = vector.extract_strided_slice %188 {offsets = [0, 64], sizes = [2, 32], strides = [1, 1]} : vector<2x128xf32> to vector<2x32xf32>
    %195 = math.tanh %194 : vector<2x32xf32>
    %196 = vector.extract_strided_slice %193 {offsets = [0, 0], sizes = [2, 32], strides = [1, 1]} : vector<2x128xf32> to vector<2x32xf32>
    %197 = vector.extract_strided_slice %193 {offsets = [0, 32], sizes = [2, 32], strides = [1, 1]} : vector<2x128xf32> to vector<2x32xf32>
    %198 = vector.extract_strided_slice %193 {offsets = [0, 96], sizes = [2, 32], strides = [1, 1]} : vector<2x128xf32> to vector<2x32xf32>
    %199 = arith.mulf %197, %165 : vector<2x32xf32>
    %200 = arith.mulf %196, %195 : vector<2x32xf32>
    %201 = arith.addf %199, %200 : vector<2x32xf32>
    %202 = math.tanh %201 : vector<2x32xf32>
    %203 = arith.mulf %198, %202 : vector<2x32xf32>
    %204 = vector.extract_strided_slice %15 {offsets = [10, 0], sizes = [2, 128], strides = [1, 1]} : vector<16x128xf32> to vector<2x128xf32>
    %205 = vector.extract_strided_slice %19 {offsets = [10, 0], sizes = [2, 128], strides = [1, 1]} : vector<16x128xf32> to vector<2x128xf32>
    %cst_45 = arith.constant dense<0.000000e+00> : vector<2x128xf32>
    %206 = tpu.matmul %186, %5, %cst_45 {dimension_numbers = #tpu.dot_dimension_numbers<[1], [0], [0], [1], [0, 0, 1, 1], [], []>} : vector<2x32xf32>, vector<32x128xf32>, vector<2x128xf32> -> vector<2x128xf32>
    %207 = arith.addf %204, %206 : vector<2x128xf32>
    %208 = arith.negf %207 : vector<2x128xf32>
    %209 = math.exp %208 : vector<2x128xf32>
    %cst_46 = arith.constant 1.000000e+00 : f32
    %210 = vector.broadcast %cst_46 : f32 to vector<2x128xf32>
    %211 = arith.addf %210, %209 : vector<2x128xf32>
    %212 = arith.divf %210, %211 : vector<2x128xf32>
    %213 = vector.extract_strided_slice %207 {offsets = [0, 64], sizes = [2, 32], strides = [1, 1]} : vector<2x128xf32> to vector<2x32xf32>
    %214 = math.tanh %213 : vector<2x32xf32>
    %215 = vector.extract_strided_slice %212 {offsets = [0, 0], sizes = [2, 32], strides = [1, 1]} : vector<2x128xf32> to vector<2x32xf32>
    %216 = vector.extract_strided_slice %212 {offsets = [0, 32], sizes = [2, 32], strides = [1, 1]} : vector<2x128xf32> to vector<2x32xf32>
    %217 = vector.extract_strided_slice %212 {offsets = [0, 96], sizes = [2, 32], strides = [1, 1]} : vector<2x128xf32> to vector<2x32xf32>
    %218 = arith.mulf %216, %184 : vector<2x32xf32>
    %219 = arith.mulf %215, %214 : vector<2x32xf32>
    %220 = arith.addf %218, %219 : vector<2x32xf32>
    %221 = math.tanh %220 : vector<2x32xf32>
    %222 = arith.mulf %217, %221 : vector<2x32xf32>
    %cst_47 = arith.constant dense<0.000000e+00> : vector<2x128xf32>
    %223 = tpu.matmul %203, %7, %cst_47 {dimension_numbers = #tpu.dot_dimension_numbers<[1], [0], [0], [1], [0, 0, 1, 1], [], []>} : vector<2x32xf32>, vector<32x128xf32>, vector<2x128xf32> -> vector<2x128xf32>
    %224 = arith.addf %205, %223 : vector<2x128xf32>
    %225 = arith.negf %224 : vector<2x128xf32>
    %226 = math.exp %225 : vector<2x128xf32>
    %cst_48 = arith.constant 1.000000e+00 : f32
    %227 = vector.broadcast %cst_48 : f32 to vector<2x128xf32>
    %228 = arith.addf %227, %226 : vector<2x128xf32>
    %229 = arith.divf %227, %228 : vector<2x128xf32>
    %230 = vector.extract_strided_slice %224 {offsets = [0, 64], sizes = [2, 32], strides = [1, 1]} : vector<2x128xf32> to vector<2x32xf32>
    %231 = math.tanh %230 : vector<2x32xf32>
    %232 = vector.extract_strided_slice %229 {offsets = [0, 0], sizes = [2, 32], strides = [1, 1]} : vector<2x128xf32> to vector<2x32xf32>
    %233 = vector.extract_strided_slice %229 {offsets = [0, 32], sizes = [2, 32], strides = [1, 1]} : vector<2x128xf32> to vector<2x32xf32>
    %234 = vector.extract_strided_slice %229 {offsets = [0, 96], sizes = [2, 32], strides = [1, 1]} : vector<2x128xf32> to vector<2x32xf32>
    %235 = arith.mulf %233, %201 : vector<2x32xf32>
    %236 = arith.mulf %232, %231 : vector<2x32xf32>
    %237 = arith.addf %235, %236 : vector<2x32xf32>
    %238 = math.tanh %237 : vector<2x32xf32>
    %239 = arith.mulf %234, %238 : vector<2x32xf32>
    %240 = vector.extract_strided_slice %15 {offsets = [12, 0], sizes = [2, 128], strides = [1, 1]} : vector<16x128xf32> to vector<2x128xf32>
    %241 = vector.extract_strided_slice %19 {offsets = [12, 0], sizes = [2, 128], strides = [1, 1]} : vector<16x128xf32> to vector<2x128xf32>
    %cst_49 = arith.constant dense<0.000000e+00> : vector<2x128xf32>
    %242 = tpu.matmul %222, %5, %cst_49 {dimension_numbers = #tpu.dot_dimension_numbers<[1], [0], [0], [1], [0, 0, 1, 1], [], []>} : vector<2x32xf32>, vector<32x128xf32>, vector<2x128xf32> -> vector<2x128xf32>
    %243 = arith.addf %240, %242 : vector<2x128xf32>
    %244 = arith.negf %243 : vector<2x128xf32>
    %245 = math.exp %244 : vector<2x128xf32>
    %cst_50 = arith.constant 1.000000e+00 : f32
    %246 = vector.broadcast %cst_50 : f32 to vector<2x128xf32>
    %247 = arith.addf %246, %245 : vector<2x128xf32>
    %248 = arith.divf %246, %247 : vector<2x128xf32>
    %249 = vector.extract_strided_slice %243 {offsets = [0, 64], sizes = [2, 32], strides = [1, 1]} : vector<2x128xf32> to vector<2x32xf32>
    %250 = math.tanh %249 : vector<2x32xf32>
    %251 = vector.extract_strided_slice %248 {offsets = [0, 0], sizes = [2, 32], strides = [1, 1]} : vector<2x128xf32> to vector<2x32xf32>
    %252 = vector.extract_strided_slice %248 {offsets = [0, 32], sizes = [2, 32], strides = [1, 1]} : vector<2x128xf32> to vector<2x32xf32>
    %253 = vector.extract_strided_slice %248 {offsets = [0, 96], sizes = [2, 32], strides = [1, 1]} : vector<2x128xf32> to vector<2x32xf32>
    %254 = arith.mulf %252, %220 : vector<2x32xf32>
    %255 = arith.mulf %251, %250 : vector<2x32xf32>
    %256 = arith.addf %254, %255 : vector<2x32xf32>
    %257 = math.tanh %256 : vector<2x32xf32>
    %258 = arith.mulf %253, %257 : vector<2x32xf32>
    %cst_51 = arith.constant dense<0.000000e+00> : vector<2x128xf32>
    %259 = tpu.matmul %239, %7, %cst_51 {dimension_numbers = #tpu.dot_dimension_numbers<[1], [0], [0], [1], [0, 0, 1, 1], [], []>} : vector<2x32xf32>, vector<32x128xf32>, vector<2x128xf32> -> vector<2x128xf32>
    %260 = arith.addf %241, %259 : vector<2x128xf32>
    %261 = arith.negf %260 : vector<2x128xf32>
    %262 = math.exp %261 : vector<2x128xf32>
    %cst_52 = arith.constant 1.000000e+00 : f32
    %263 = vector.broadcast %cst_52 : f32 to vector<2x128xf32>
    %264 = arith.addf %263, %262 : vector<2x128xf32>
    %265 = arith.divf %263, %264 : vector<2x128xf32>
    %266 = vector.extract_strided_slice %260 {offsets = [0, 64], sizes = [2, 32], strides = [1, 1]} : vector<2x128xf32> to vector<2x32xf32>
    %267 = math.tanh %266 : vector<2x32xf32>
    %268 = vector.extract_strided_slice %265 {offsets = [0, 0], sizes = [2, 32], strides = [1, 1]} : vector<2x128xf32> to vector<2x32xf32>
    %269 = vector.extract_strided_slice %265 {offsets = [0, 32], sizes = [2, 32], strides = [1, 1]} : vector<2x128xf32> to vector<2x32xf32>
    %270 = vector.extract_strided_slice %265 {offsets = [0, 96], sizes = [2, 32], strides = [1, 1]} : vector<2x128xf32> to vector<2x32xf32>
    %271 = arith.mulf %269, %237 : vector<2x32xf32>
    %272 = arith.mulf %268, %267 : vector<2x32xf32>
    %273 = arith.addf %271, %272 : vector<2x32xf32>
    %274 = math.tanh %273 : vector<2x32xf32>
    %275 = arith.mulf %270, %274 : vector<2x32xf32>
    %276 = vector.extract_strided_slice %15 {offsets = [14, 0], sizes = [2, 128], strides = [1, 1]} : vector<16x128xf32> to vector<2x128xf32>
    %277 = vector.extract_strided_slice %19 {offsets = [14, 0], sizes = [2, 128], strides = [1, 1]} : vector<16x128xf32> to vector<2x128xf32>
    %cst_53 = arith.constant dense<0.000000e+00> : vector<2x128xf32>
    %278 = tpu.matmul %258, %5, %cst_53 {dimension_numbers = #tpu.dot_dimension_numbers<[1], [0], [0], [1], [0, 0, 1, 1], [], []>} : vector<2x32xf32>, vector<32x128xf32>, vector<2x128xf32> -> vector<2x128xf32>
    %279 = arith.addf %276, %278 : vector<2x128xf32>
    %280 = arith.negf %279 : vector<2x128xf32>
    %281 = math.exp %280 : vector<2x128xf32>
    %cst_54 = arith.constant 1.000000e+00 : f32
    %282 = vector.broadcast %cst_54 : f32 to vector<2x128xf32>
    %283 = arith.addf %282, %281 : vector<2x128xf32>
    %284 = arith.divf %282, %283 : vector<2x128xf32>
    %285 = vector.extract_strided_slice %279 {offsets = [0, 64], sizes = [2, 32], strides = [1, 1]} : vector<2x128xf32> to vector<2x32xf32>
    %286 = math.tanh %285 : vector<2x32xf32>
    %287 = vector.extract_strided_slice %284 {offsets = [0, 0], sizes = [2, 32], strides = [1, 1]} : vector<2x128xf32> to vector<2x32xf32>
    %288 = vector.extract_strided_slice %284 {offsets = [0, 32], sizes = [2, 32], strides = [1, 1]} : vector<2x128xf32> to vector<2x32xf32>
    %289 = vector.extract_strided_slice %284 {offsets = [0, 96], sizes = [2, 32], strides = [1, 1]} : vector<2x128xf32> to vector<2x32xf32>
    %290 = arith.mulf %288, %256 : vector<2x32xf32>
    %291 = arith.mulf %287, %286 : vector<2x32xf32>
    %292 = arith.addf %290, %291 : vector<2x32xf32>
    %293 = math.tanh %292 : vector<2x32xf32>
    %294 = arith.mulf %289, %293 : vector<2x32xf32>
    %cst_55 = arith.constant dense<0.000000e+00> : vector<2x128xf32>
    %295 = tpu.matmul %275, %7, %cst_55 {dimension_numbers = #tpu.dot_dimension_numbers<[1], [0], [0], [1], [0, 0, 1, 1], [], []>} : vector<2x32xf32>, vector<32x128xf32>, vector<2x128xf32> -> vector<2x128xf32>
    %296 = arith.addf %277, %295 : vector<2x128xf32>
    %297 = arith.negf %296 : vector<2x128xf32>
    %298 = math.exp %297 : vector<2x128xf32>
    %cst_56 = arith.constant 1.000000e+00 : f32
    %299 = vector.broadcast %cst_56 : f32 to vector<2x128xf32>
    %300 = arith.addf %299, %298 : vector<2x128xf32>
    %301 = arith.divf %299, %300 : vector<2x128xf32>
    %302 = vector.extract_strided_slice %296 {offsets = [0, 64], sizes = [2, 32], strides = [1, 1]} : vector<2x128xf32> to vector<2x32xf32>
    %303 = math.tanh %302 : vector<2x32xf32>
    %304 = vector.extract_strided_slice %301 {offsets = [0, 0], sizes = [2, 32], strides = [1, 1]} : vector<2x128xf32> to vector<2x32xf32>
    %305 = vector.extract_strided_slice %301 {offsets = [0, 32], sizes = [2, 32], strides = [1, 1]} : vector<2x128xf32> to vector<2x32xf32>
    %306 = vector.extract_strided_slice %301 {offsets = [0, 96], sizes = [2, 32], strides = [1, 1]} : vector<2x128xf32> to vector<2x32xf32>
    %307 = arith.mulf %305, %273 : vector<2x32xf32>
    %308 = arith.mulf %304, %303 : vector<2x32xf32>
    %309 = arith.addf %307, %308 : vector<2x32xf32>
    %310 = math.tanh %309 : vector<2x32xf32>
    %311 = arith.mulf %306, %310 : vector<2x32xf32>
    %312 = tpu.concatenate %42, %78, %114, %150, %186, %222, %258, %294 in 1 : vector<2x32xf32>, vector<2x32xf32>, vector<2x32xf32>, vector<2x32xf32>, vector<2x32xf32>, vector<2x32xf32>, vector<2x32xf32>, vector<2x32xf32> -> vector<2x256xf32>
    %313 = tpu.concatenate %59, %95, %131, %167, %203, %239, %275, %311 in 1 : vector<2x32xf32>, vector<2x32xf32>, vector<2x32xf32>, vector<2x32xf32>, vector<2x32xf32>, vector<2x32xf32>, vector<2x32xf32>, vector<2x32xf32> -> vector<2x256xf32>
    %c0_57 = arith.constant 0 : index
    %c0_58 = arith.constant 0 : index
    %c0_59 = arith.constant 0 : index
    %314 = vector.load %arg7[%c0_57, %c0_58, %c0_59] : memref<2x2x256xf32, #tpu.memory_space<vmem>>, vector<1x2x256xf32>
    %315 = vector.shape_cast %314 : vector<1x2x256xf32> to vector<2x256xf32>
    %316 = vector.shape_cast %312 : vector<2x256xf32> to vector<1x2x256xf32>
    tpu.vector_store %arg7[%c0_57, %c0_58, %c0_59], %316 {strides = array<i32>} : memref<2x2x256xf32, #tpu.memory_space<vmem>>, vector<1x2x256xf32>,
    %c1_60 = arith.constant 1 : index
    %c0_61 = arith.constant 0 : index
    %c0_62 = arith.constant 0 : index
    %317 = vector.load %arg7[%c1_60, %c0_61, %c0_62] : memref<2x2x256xf32, #tpu.memory_space<vmem>>, vector<1x2x256xf32>
    %318 = vector.shape_cast %317 : vector<1x2x256xf32> to vector<2x256xf32>
    %319 = vector.shape_cast %313 : vector<2x256xf32> to vector<1x2x256xf32>
    tpu.vector_store %arg7[%c1_60, %c0_61, %c0_62], %319 {strides = array<i32>} : memref<2x2x256xf32, #tpu.memory_space<vmem>>, vector<1x2x256xf32>,
    %c0_63 = arith.constant 0 : index
    %c0_64 = arith.constant 0 : index
    %c0_65 = arith.constant 0 : index
    %320 = vector.load %arg5[%c0_63, %c0_64, %c0_65] : memref<2x256x128xf32, #tpu.memory_space<vmem>>, vector<1x256x128xf32>
    %321 = vector.shape_cast %320 : vector<1x256x128xf32> to vector<256x128xf32>
    %cst_66 = arith.constant dense<0.000000e+00> : vector<2x128xf32>
    %322 = tpu.matmul %312, %321, %cst_66 {dimension_numbers = #tpu.dot_dimension_numbers<[1], [0], [0], [1], [0, 0, 1, 1], [], []>} : vector<2x256xf32>, vector<256x128xf32>, vector<2x128xf32> -> vector<2x128xf32>
    %c0_67 = arith.constant 0 : index
    %c0_68 = arith.constant 0 : index
    %c0_69 = arith.constant 0 : index
    %323 = vector.load %arg6[%c0_67, %c0_68, %c0_69] : memref<2x1x128xf32, #tpu.memory_space<vmem>>, vector<1x1x128xf32>
    %324 = vector.shape_cast %323 : vector<1x1x128xf32> to vector<1x128xf32>
    %325 = vector.broadcast %324 : vector<1x128xf32> to vector<2x128xf32>
    %326 = arith.addf %322, %325 : vector<2x128xf32>
    %c0_70 = arith.constant 0 : index
    %c0_71 = arith.constant 0 : index
    %c0_72 = arith.constant 0 : index
    %327 = vector.load %arg8[%c0_70, %c0_71, %c0_72] : memref<2x2x128xf32, #tpu.memory_space<vmem>>, vector<1x2x128xf32>
    %328 = vector.shape_cast %327 : vector<1x2x128xf32> to vector<2x128xf32>
    %329 = vector.shape_cast %326 : vector<2x128xf32> to vector<1x2x128xf32>
    tpu.vector_store %arg8[%c0_70, %c0_71, %c0_72], %329 {strides = array<i32>} : memref<2x2x128xf32, #tpu.memory_space<vmem>>, vector<1x2x128xf32>,
    %c1_73 = arith.constant 1 : index
    %c0_74 = arith.constant 0 : index
    %c0_75 = arith.constant 0 : index
    %330 = vector.load %arg5[%c1_73, %c0_74, %c0_75] : memref<2x256x128xf32, #tpu.memory_space<vmem>>, vector<1x256x128xf32>
    %331 = vector.shape_cast %330 : vector<1x256x128xf32> to vector<256x128xf32>
    %cst_76 = arith.constant dense<0.000000e+00> : vector<2x128xf32>
    %332 = tpu.matmul %313, %331, %cst_76 {dimension_numbers = #tpu.dot_dimension_numbers<[1], [0], [0], [1], [0, 0, 1, 1], [], []>} : vector<2x256xf32>, vector<256x128xf32>, vector<2x128xf32> -> vector<2x128xf32>
    %c1_77 = arith.constant 1 : index
    %c0_78 = arith.constant 0 : index
    %c0_79 = arith.constant 0 : index
    %333 = vector.load %arg6[%c1_77, %c0_78, %c0_79] : memref<2x1x128xf32, #tpu.memory_space<vmem>>, vector<1x1x128xf32>
    %334 = vector.shape_cast %333 : vector<1x1x128xf32> to vector<1x128xf32>
    %335 = vector.broadcast %334 : vector<1x128xf32> to vector<2x128xf32>
    %336 = arith.addf %332, %335 : vector<2x128xf32>
    %c1_80 = arith.constant 1 : index
    %c0_81 = arith.constant 0 : index
    %c0_82 = arith.constant 0 : index
    %337 = vector.load %arg8[%c1_80, %c0_81, %c0_82] : memref<2x2x128xf32, #tpu.memory_space<vmem>>, vector<1x2x128xf32>
    %338 = vector.shape_cast %337 : vector<1x2x128xf32> to vector<2x128xf32>
    %339 = vector.shape_cast %336 : vector<2x128xf32> to vector<1x2x128xf32>
    tpu.vector_store %arg8[%c1_80, %c0_81, %c0_82], %339 {strides = array<i32>} : memref<2x2x128xf32, #tpu.memory_space<vmem>>, vector<1x2x128xf32>,
    return
  }
}

</mosaic_0001>

<bundles_post_ra>
// kernel: squeeze.7
= control target key start
LH: loop header
LB: loop body
LE: loop exit
PB: predicated region body
PF: predicated region fallthrough
CT: control target
= control target key end

     0   :  { %s135_s0 = inlined_call_operand.vmem [shape: f32[1,2,128], index: 0, kind: input, shape index: {}]   ;;  %s136_s1 = inlined_call_operand.hbm [shape: f32[16,16], index: 1, kind: output, shape index: {}]  }
   0x1   :  { %v5_v0 = vld [vmem:[%s135_s0] sm:$0x3] }
   0x2   :  { %6 = vst [vmem:[#allocation2] sm:$0x3] %v5_v0 }
   0x3   :  { %2 = vsyncpa [#allocation1], 0  ;;  %s94_s0 = smov 112   ;;  %s95_s8 = smov 80   ;;  %vm8_vm0 = vcmask 130048  }
   0x4   :  { %s96_s9 = smov 96   ;;  %s97_s10 = smov 64  }
   0x5   :  { %s98_s11 = smov 48   ;;  %s99_s12 = smov 32  }
   0x6   :  { %s100_s13 = smov 16   ;;  %s101_s14 = smov [#allocation0]  }
   0x7   :  { %s56_s15 = sshll.u32 %s101_s14, 4  ;;  %s57_s15 = int_to_ptr.vmem [resolvable:$true] %s56_s15 }
   0x8   :  { %s70_s16 = scalar_lea.vmem %s57_s15, 256  ;;  %p75_p1 = scmp.lt.s32.totalorder %s57_s15, %s57_s15 }
   0x9   :  { %v10_v1 = vld [vmem:[#allocation2] sm:$0x3]   ;;  %p71_p0 = scmp.ne.s32.totalorder %s57_s15, %s70_s16  ;;  %p76_p2 = scmp.lt.s32.totalorder %s70_s16, %s70_s16 }
   0xa   :  { %v22_v2 = vld [vmem:[#allocation2] sm:$0x3]   ;;  %11 = vrot.lane.b32.xlu0 %v10_v1, %s94_s0 }
   0xb   :  { %23 = vrot.lane.b32.xlu1 %v22_v2, %s95_s8  ;;  %v16_v3 = vld [vmem:[#allocation2] sm:$0x3]   ;;  %p77_p3 = por %p76_p2, %p75_p1 }
   0xc   :  { %v28_v4 = vld [vmem:[#allocation2] sm:$0x3]  }
   0xd   :  { %v7_v5 = vld [vmem:[#allocation2] sm:$0x3]   ;;  %p78_p4 = pnand %p77_p3, %p71_p0 }
   0xe   :  { %9 = vst.msk [vmem:[#allocation0] ss:$8 sm:$0x3] %vm8_vm0, %v7_v5   ;;  %17 = vrot.lane.b32.xlu0 %v16_v3, %s96_s9  ;;  %v34_v6 = vld [vmem:[#allocation2] sm:$0x3]  }
   0xf   :  { %29 = vrot.lane.b32.xlu1 %v28_v4, %s97_s10  ;;  %v40_v7 = vld [vmem:[#allocation2] sm:$0x3]  }
  0x10   :  { %v46_v8 = vld [vmem:[#allocation2] sm:$0x3]  }
  0x12   :  { %35 = vrot.lane.b32.xlu0 %v34_v6, %s98_s11 }
  0x13   :  { %41 = vrot.lane.b32.xlu1 %v40_v7, %s99_s12 }
  0x16   :  { %47 = vrot.lane.b32.xlu0 %v46_v8, %s100_s13 }
  0x7c   :  { %v12_v9 = vpop.permute.xlu0 %11  }
  0x7d   :  { %v24_v10 = vpop.permute.xlu1 %23   ;;  %15 = vst.msk [vmem:[#allocation0 + $0x1] ss:$8 sm:$0x3] %vm8_vm0, %v12_v9  }
  0x7e   :  { %27 = vst.msk [vmem:[#allocation0 + $0x3] ss:$8 sm:$0x3] %vm8_vm0, %v24_v10  }
  0x80   :  { %v18_v11 = vpop.permute.xlu0 %17  }
  0x81   :  { %v30_v12 = vpop.permute.xlu1 %29   ;;  %21 = vst.msk [vmem:[#allocation0 + $0x2] ss:$8 sm:$0x3] %vm8_vm0, %v18_v11  }
  0x82   :  { %33 = vst.msk [vmem:[#allocation0 + $0x4] ss:$8 sm:$0x3] %vm8_vm0, %v30_v12  }
  0x84   :  { %v36_v13 = vpop.permute.xlu0 %35  }
  0x85   :  { %v42_v14 = vpop.permute.xlu1 %41   ;;  %39 = vst.msk [vmem:[#allocation0 + $0x5] ss:$8 sm:$0x3] %vm8_vm0, %v36_v13  }
  0x86   :  { %45 = vst.msk [vmem:[#allocation0 + $0x6] ss:$8 sm:$0x3] %vm8_vm0, %v42_v14  }
  0x88   :  { %v48_v15 = vpop.permute.xlu0 %47  }
  0x89   :  { %51 = vst.msk [vmem:[#allocation0 + $0x7] ss:$8 sm:$0x3] %vm8_vm0, %v48_v15  }
  0x8a   :  { %81 = shalt.err (!%p78_p4)
}
  0x8b   :  { %s82_s19 = scalar_lea.hbm %s136_s1, 256 }
  0x8c   :  { %p83_p5 = scmp.ne.s32.totalorder %s136_s1, %s82_s19  ;;  %p86_p6 = scmp.lt.u32.totalorder %s82_s19, %s136_s1 }
  0x8e   :  { %p88_p7 = pnand %p86_p6, %p83_p5 }
  0x90   :  { %91 = shalt.err (!%p88_p7)
}
  0x91   :  { %59 = dma.vmem_to_hbm [thread:$0]  %s57_s15, 256, %s136_s1, [#allocation1]  }
  0x92   :  { %92 = dma.done.wait [#allocation1], 256  }
  0x93   :  { %93 = vsyncadd [#allocation1], 4294967040 }
  0x94   :  { %61 = vsyncpa [#allocation1], 1 }

// kernel: squeeze.5
= control target key start
LH: loop header
LB: loop body
LE: loop exit
PB: predicated region body
PF: predicated region fallthrough
CT: control target
= control target key end

     0   :  { %s113_s0 = inlined_call_operand.vmem [shape: f32[1,2,256], index: 0, kind: input, shape index: {}]   ;;  %s114_s1 = inlined_call_operand.hbm [shape: f32[16,32], index: 1, kind: output, shape index: {}]  }
   0x1   :  { %v47_v0 = vld [vmem:[%s113_s0 + $0x2] sm:$0x3]  ;;  %v9_v1 = vld [vmem:[%s113_s0] sm:$0x3] }
   0x2   :  { %8 = vst [vmem:[#allocation2 + $0x8] sm:$0x3] %v47_v0  ;;  %10 = vst [vmem:[#allocation2] sm:$0x3] %v9_v1 }
   0x3   :  { %2 = vsyncpa [#allocation1], 0  ;;  %vm12_vm0 = vcmask 261120   ;;  %s76_s0 = smov 96   ;;  %s77_s10 = smov 32  }
   0x4   :  { %s78_s11 = smov 64   ;;  %s79_s12 = smov [#allocation0]  }
   0x5   :  { %s41_s13 = sshll.u32 %s79_s12, 4  ;;  %s42_s13 = int_to_ptr.vmem [resolvable:$true] %s41_s13 }
   0x6   :  { %s52_s14 = scalar_lea.vmem %s42_s13, 256  ;;  %p57_p1 = scmp.lt.s32.totalorder %s42_s13, %s42_s13 }
   0x7   :  { %p53_p0 = scmp.ne.s32.totalorder %s42_s13, %s52_s14  ;;  %p58_p2 = scmp.lt.s32.totalorder %s52_s14, %s52_s14 }
   0x9   :  { %v19_v2 = vld.sshfl [vmem:[#allocation2] sm:$0xff pattern:$0x99999180]   ;;  %p59_p3 = por %p58_p2, %p57_p1 }
   0xa   :  { %v11_v3 = vld [vmem:[#allocation2] sm:$0x3]   ;;  %20 = vrot.lane.b32.xlu0 %v19_v2, %s76_s0  ;;  %32 = vrot.lane.b32.xlu1 %v19_v2, %s77_s10  ;;  %v15_v4 = vld [vmem:[#allocation2 + $0x8] sm:$0x3]  }
   0xb   :  { %13 = vst.msk [vmem:[#allocation0] ss:$8 sm:$0x3] %vm12_vm0, %v11_v3   ;;  %18 = vst.msk [vmem:[#allocation0 + $0x4] ss:$8 sm:$0x3] %vm12_vm0, %v15_v4   ;;  %p60_p4 = pnand %p59_p3, %p53_p0 }
   0xe   :  { %26 = vrot.lane.b32.xlu0 %v19_v2, %s78_s11 }
  0x7c   :  { %v21_v5 = vpop.permute.xlu0 %20   ;;  %v33_v6 = vpop.permute.xlu1 %32  }
  0x7d   :  { %24 = vst.msk [vmem:[#allocation0 + $0x1] ss:$4 sm:$0xf] %vm12_vm0, %v21_v5   ;;  %36 = vst.msk [vmem:[#allocation0 + $0x3] ss:$4 sm:$0xf] %vm12_vm0, %v33_v6  }
  0x80   :  { %v27_v7 = vpop.permute.xlu0 %26  }
  0x81   :  { %30 = vst.msk [vmem:[#allocation0 + $0x2] ss:$4 sm:$0xf] %vm12_vm0, %v27_v7  }
  0x82   :  { %63 = shalt.err (!%p60_p4)
}
  0x83   :  { %s64_s17 = scalar_lea.hbm %s114_s1, 256 }
  0x84   :  { %p65_p5 = scmp.ne.s32.totalorder %s114_s1, %s64_s17  ;;  %p68_p6 = scmp.lt.u32.totalorder %s64_s17, %s114_s1 }
  0x86   :  { %p70_p7 = pnand %p68_p6, %p65_p5 }
  0x88   :  { %73 = shalt.err (!%p70_p7)
}
  0x89   :  { %44 = dma.vmem_to_hbm [thread:$0]  %s42_s13, 256, %s114_s1, [#allocation1]  }
  0x8a   :  { %74 = dma.done.wait [#allocation1], 256  }
  0x8b   :  { %75 = vsyncadd [#allocation1], 4294967040 }
  0x8c   :  { %46 = vsyncpa [#allocation1], 1 }

// kernel: temporal_proposal_forward.1
= control target key start
LH: loop header
LB: loop body
LE: loop exit
PB: predicated region body
PF: predicated region fallthrough
CT: control target
= control target key end

     0   :  { %14 = vsyncpa [#allocation3], 0  ;;  %s3585_s0 = inlined_call_operand.vmem [shape: f32[16,32], index: 0, kind: input, shape index: {}]   ;;  %s3586_s1 = inlined_call_operand.vmem [shape: f32[16,32], index: 1, kind: input, shape index: {}]   ;;  %s3587_s2 = inlined_call_operand.vmem [shape: f32[2,32,128], index: 2, kind: input, shape index: {}]   ;;  %s3588_s3 = inlined_call_operand.hbm [shape: f32[2,32,128], index: 3, kind: input, shape index: {}]   ;;  %s3589_s4 = inlined_call_operand.vmem [shape: f32[2,1,128], index: 4, kind: input, shape index: {}]   ;;  %s3590_s5 = inlined_call_operand.hbm [shape: f32[2,256,128], index: 5, kind: input, shape index: {}]   ;;  %s3591_s6 = inlined_call_operand.hbm [shape: f32[2,1,128], index: 6, kind: input, shape index: {}]   ;;  %s3592_s7 = inlined_call_operand.vmem [shape: f32[2,2,256], index: 7, kind: output, shape index: {0}]   ;;  %s3593_s8 = inlined_call_operand.vmem [shape: f32[2,2,128], index: 8, kind: output, shape index: {1}]  }
   0x1   :  { %15 = vsyncpa [#allocation5], 0  ;;  %s3052_s27 = smov [#allocation4]   ;;  %s3053_s29 = smov [#allocation2]  }
   0x2   :  { %s41_s28 = sshll.u32 %s3052_s27, 4  ;;  %s27_s30 = sshll.u32 %s3053_s29, 4  ;;  %s42_s28 = int_to_ptr.vmem [resolvable:$true] %s41_s28  ;;  %s3110_s30 = int_to_ptr.vmem [resolvable:$true] %s27_s30 }
   0x3   :  { %s2982_s11 = scalar_lea.hbm %s3590_s5, 8192 }
   0x4   :  { %p2983_p0 = scmp.ne.s32.totalorder %s3590_s5, %s2982_s11  ;;  %p2986_p1 = scmp.lt.u32.totalorder %s2982_s11, %s3590_s5 }
   0x6   :  { %p2988_p2 = pnand %p2986_p1, %p2983_p0 }
   0x8   :  { %2991 = shalt.err (!%p2988_p2)
}
   0x9   :  { %s2992_s16 = scalar_lea.vmem %s42_s28, 8192  ;;  %p2997_p4 = scmp.lt.s32.totalorder %s42_s28, %s42_s28 }
   0xa   :  { %p2993_p3 = scmp.ne.s32.totalorder %s42_s28, %s2992_s16  ;;  %p2998_p5 = scmp.lt.s32.totalorder %s2992_s16, %s2992_s16 }
   0xc   :  { %p2999_p6 = por %p2998_p5, %p2997_p4 }
   0xe   :  { %p3000_p7 = pnand %p2999_p6, %p2993_p3 }
  0x10   :  { %3003 = shalt.err (!%p3000_p7)
}
  0x11   :  { %s3054_s17 = smov 128   ;;  %s3055_s18 = smov 8  }
  0x12   :  { %47 = dma.hbm_to_vmem [thread:$0]  %s3590_s5, 8192, %s42_s28, [#allocation5], %s3054_s17, %s3054_s17, %s3055_s18  }
  0x13   :  { %s3004_s23 = scalar_lea.hbm %s3588_s3, 1024 }
  0x14   :  { %p3005_p8 = scmp.ne.s32.totalorder %s3588_s3, %s3004_s23  ;;  %p3008_p9 = scmp.lt.u32.totalorder %s3004_s23, %s3588_s3 }
  0x16   :  { %p3010_p10 = pnand %p3008_p9, %p3005_p8 }
  0x18   :  { %3013 = shalt.err (!%p3010_p10)
}
  0x19   :  { %s3014_s29 = scalar_lea.vmem %s3110_s30, 1024  ;;  %p3019_p12 = scmp.lt.s32.totalorder %s3110_s30, %s3110_s30 }
  0x1a   :  { %p3015_p11 = scmp.ne.s32.totalorder %s3110_s30, %s3014_s29  ;;  %p3020_p13 = scmp.lt.s32.totalorder %s3014_s29, %s3014_s29 }
  0x1c   :  { %p3021_p0 = por %p3020_p13, %p3019_p12 }
  0x1e   :  { %p3022_p1 = pnand %p3021_p0, %p3015_p11 }
  0x20   :  { %3025 = shalt.err (!%p3022_p1)
}
  0x21   :  { %33 = dma.hbm_to_vmem [thread:$0]  %s3588_s3, 1024, %s3110_s30, [#allocation3], %s3054_s17, %s3054_s17, %s3055_s18  }
  0x22   :  { %s3056_s9 = smov [#allocation6]   ;;  %s3026_s13 = scalar_lea.hbm %s3591_s6, 32 }
  0x23   :  { %s53_s10 = sshll.u32 %s3056_s9, 4  ;;  %p3027_p2 = scmp.ne.s32.totalorder %s3591_s6, %s3026_s13  ;;  %s54_s10 = int_to_ptr.vmem [resolvable:$true] %s53_s10 }
  0x24   :  { %p3030_p3 = scmp.lt.u32.totalorder %s3026_s13, %s3591_s6 }
  0x26   :  { %p3032_p4 = pnand %p3030_p3, %p3027_p2 }
  0x28   :  { %3035 = shalt.err (!%p3032_p4)
}
  0x29   :  { %s3036_s20 = scalar_lea.vmem %s54_s10, 32  ;;  %p3041_p6 = scmp.lt.s32.totalorder %s54_s10, %s54_s10 }
  0x2a   :  { %p3037_p5 = scmp.ne.s32.totalorder %s54_s10, %s3036_s20  ;;  %p3042_p7 = scmp.lt.s32.totalorder %s3036_s20, %s3036_s20 }
  0x2c   :  { %p3043_p8 = por %p3042_p7, %p3041_p6 }
  0x2e   :  { %p3044_p9 = pnand %p3043_p8, %p3037_p5 }
  0x30   :  { %3047 = shalt.err (!%p3044_p9)
}
  0x31   :  { %s3057_s3 = smov 16   ;;  %s3058_s30 = smov 1  }
  0x32   :  { %59 = dma.hbm_to_vmem [thread:$0]  %s3591_s6, 32, %s54_s10, [#allocation5], %s3057_s3, %s3057_s3, %s3058_s30  }
  0x33   :  { %3048 = dma.done.wait [#allocation3], 1024  }
  0x34   :  { %3049 = vsyncadd [#allocation3], 4294966272 }
  0x35   :  { %3050 = dma.done.wait [#allocation5], 8224  }
  0x36   :  { %3051 = vsyncadd [#allocation5], 4294959072  ;;  %v69_v0 = vld [vmem:[%s3587_s2] sm:$0xff]  ;;  %v70_v1 = vld [vmem:[%s3587_s2 + $0x8] sm:$0xff]  ;;  %vm98_vm0 = vcmask 261120   ;;  %v3059_v20 = vmov 0.0|0.0  }
  0x37   :  { %v2258_v2 = vld [vmem:[%s3587_s2 + $0x20] sm:$0xff]  ;;  %v2665_v3 = vpack.c.bf16 %v70_v1, %v69_v0  ;;  %v2259_v4 = vld [vmem:[%s3587_s2 + $0x28] sm:$0xff]  ;;  %v71_v5 = vld [vmem:[%s3587_s2 + $0x10] sm:$0xff]  ;;  %vm3060_vm1 = vmmov 0   ;;  %v3061_v29 = vmov 0.0   ;;  %s3063_s21 = smov 32  }
  0x38   :  { %v72_v6 = vld [vmem:[%s3587_s2 + $0x18] sm:$0xff]  ;;  %v2673_v7 = vpack.c.bf16 %v2259_v4, %v2258_v2  ;;  %v2260_v9 = vld [vmem:[%s3587_s2 + $0x30] sm:$0xff]  ;;  %v90_v11 = vld [vmem:[%s3585_s0] sm:$0xff]  ;;  %s3064_s22 = smov 96   ;;  %vm1969_vm2 = vcmask 523264   ;;  %vm1971_vm3 = vcmask 785408  }
  0x39   :  { %v2669_v8 = vpack.c.bf16 %v72_v6, %v71_v5  ;;  %v2261_v10 = vld [vmem:[%s3587_s2 + $0x38] sm:$0xff]  ;;  %2666 = vmatprep.subr.bf16.mxu0 %v2665_v3  ;;  %2475 = vmatprep.mubr.msk.f32.mxu0 %vm98_vm0, %v90_v11  ;;  %v180_v13 = vld [vmem:[%s3586_s1] sm:$0xff]  ;;  %v79_v15 = vld [vmem:[#allocation2 + $0x8] sm:$0xff] }
  0x3a   :  { %v2677_v12 = vpack.c.bf16 %v2261_v10, %v2260_v9  ;;  %2674 = vmatprep.subr.bf16.mxu1 %v2673_v7  ;;  %2668 = vmatpush3.bf16.msra.mxu0 %v2665_v3  ;;  %v78_v14 = vld [vmem:[#allocation2] sm:$0xff]  ;;  %v84_v17 = vld [vmem:[#allocation2 + $0x28] sm:$0xff]  ;;  %v80_v23 = vld [vmem:[#allocation2 + $0x10] sm:$0xff] }
  0x3b   :  { %2676 = vmatpush3.bf16.msra.mxu1 %v2673_v7  ;;  %2670 = vmatprep.subr.bf16.mxu0 %v2669_v8  ;;  %v83_v16 = vld [vmem:[#allocation2 + $0x20] sm:$0xff]  ;;  %v91_v18 = vld [vmem:[%s3585_s0 + $0x8] sm:$0xff]  ;;  %v3188_v19 = vpack.c.bf16 %v79_v15, %v78_v14  ;;  %v81_v24 = vld [vmem:[#allocation2 + $0x18] sm:$0xff] }
  0x3c   :  { %2678 = vmatprep.subr.bf16.mxu1 %v2677_v12  ;;  %2486 = vmatprep.mubr.msk.f32.mxu1 %vm98_vm0, %v180_v13  ;;  %v181_v21 = vld [vmem:[%s3586_s1 + $0x8] sm:$0xff]  ;;  %v3194_v22 = vpack.c.bf16 %v84_v17, %v83_v16  ;;  %v85_v25 = vld [vmem:[#allocation2 + $0x30] sm:$0xff]  ;;  %v86_v26 = vld [vmem:[#allocation2 + $0x38] sm:$0xff]  ;;  %v3200_v27 = vpack.c.bf16 %v81_v24, %v80_v23 }
  0x3d   :  { %v3204_v28 = vpack.c.bf16 %v86_v26, %v85_v25  ;;  %v2263_v30 = vld [vmem:[%s3589_s4] ss:$0 sm:$0xff]  ;;  %v2266_v31 = vld [vmem:[%s3589_s4 + $0x1] ss:$0 sm:$0xff]  ;;  %s3062_s4 = smov 64  }
  0x3e   :  { %2672 = vmatpush3.bf16.msra.mxu0 %v2669_v8 }
  0x3f   :  { %2680 = vmatpush3.bf16.msra.mxu1 %v2677_v12  ;;  %2681 = vmatprep.subr.bf16.mxu0 %v3059_v20 }
  0x40   :  { %2687 = vmatprep.subr.bf16.mxu1 %v3059_v20 }
  0x41   :  { %2476 = vmatmul.mubr.msk.f32.vlgmr.msra.gmra.mrb[0].mxu0 %vm98_vm0, %v91_v18 }
  0x42   :  { %2487 = vmatmul.mubr.msk.f32.vlgmr.msra.gmra.mrb[0].mxu1 %vm98_vm0, %v181_v21  ;;  %2683 = vmatpush3.bf16.msra.mxu0 %v3188_v19 }
  0x43   :  { %2689 = vmatpush3.bf16.msra.mxu1 %v3194_v22  ;;  %2684 = vmatprep.subr.bf16.mxu0 %v3059_v20 }
  0x44   :  { %2690 = vmatprep.subr.bf16.mxu1 %v3059_v20  ;;  %2497 = vmatprep.mubr.msk.f32.mxu0 %vm3060_vm1, %v3061_v29 }
  0x45   :  { %2508 = vmatprep.mubr.msk.f32.mxu1 %vm3060_vm1, %v3061_v29 }
  0x46   :  { %2686 = vmatpush3.bf16.msra.mxu0 %v3200_v27 }
  0x47   :  { %2692 = vmatpush3.bf16.msra.mxu1 %v3204_v28  ;;  %2693 = vmatprep.subr.bf16.mxu0 %v3059_v20 }
  0x48   :  { %2699 = vmatprep.subr.bf16.mxu1 %v3059_v20 }
  0x49   :  { %2498 = vmatmul.mubr.f32.vlgmr.msra.gmra.mrb[2].mxu0 %v3061_v29 }
  0x4a   :  { %2509 = vmatmul.mubr.f32.vlgmr.msra.gmra.mrb[2].mxu1 %v3061_v29  ;;  %2695 = vmatpush3.bf16.msra.mxu0 %v3188_v19 }
  0x4b   :  { %2696 = vmatprep.subr.bf16.mxu0 %v3059_v20  ;;  %2701 = vmatpush3.bf16.msra.mxu1 %v3194_v22 }
  0x4c   :  { %2519 = vmatprep.mubr.msk.f32.mxu0 %vm3060_vm1, %v3061_v29  ;;  %2702 = vmatprep.subr.bf16.mxu1 %v3059_v20 }
  0x4d   :  { %2530 = vmatprep.mubr.msk.f32.mxu1 %vm3060_vm1, %v3061_v29 }
  0x4e   :  { %2698 = vmatpush3.bf16.msra.mxu0 %v3200_v27 }
  0x4f   :  { %2704 = vmatpush3.bf16.msra.mxu1 %v3204_v28  ;;  %2705 = vmatprep.subr.bf16.mxu0 %v3059_v20 }
  0x50   :  { %2711 = vmatprep.subr.bf16.mxu1 %v3059_v20 }
 0x114   :  { %v2477_v32 = vpop.f32.mrb[0].mxu0 }
 0x115   :  { %v3235_v33 = vadd.f32 %v2477_v32, %v2263_v30  ;;  %v171_v34 = vpop.f32.mrb[1].mxu0  ;;  %v2488_v35 = vpop.f32.mrb[0].mxu1 }
 0x116   :  { %v3237_v36 = vadd.f32 %v2488_v35, %v2266_v31  ;;  %v260_v37 = vpop.f32.mrb[1].mxu1  ;;  %v3239_v38 = vadd.f32 %v2263_v30, %v171_v34 }
 0x117   :  { %v3241_v39 = vadd.f32 %v2266_v31, %v260_v37 }
 0x11c   :  { %v338_v40 = vpop.f32.mrb[2].mxu0 }
 0x11d   :  { %v342_v41 = vadd.f32 %v338_v40, %v3239_v38  ;;  %v433_v42 = vpop.f32.mrb[2].mxu1  ;;  %v2499_v43 = vpop.f32.mrb[3].mxu0 }
 0x11e   :  { %v2510_v44 = vpop.f32.mrb[3].mxu1  ;;  %v437_v45 = vadd.f32 %v433_v42, %v3241_v39 }
 0x11f   :  { %2854 = vtanh.f32 %v342_v41  ;;  %v2269_v48 = vmul.f32 -1.442695, %v342_v41 }
 0x120   :  { %2856 = vtanh.f32 %v437_v45  ;;  %v2270_v49 = vmul.f32 -1.442695, %v437_v45 }
 0x121   :  { %2858 = vpow2.f32 %v2269_v48 }
 0x122   :  { %2860 = vpow2.f32 %v2270_v49 }
 0x129   :  { %v2855_v46 = vpop.eup %2854 }
 0x12a   :  { %352 = vrot.lane.b32.xlu0 %v2855_v46, %s3062_s4  ;;  %v2857_v47 = vpop.eup %2856 }
 0x12b   :  { %v2859_v50 = vpop.eup %2858 }
 0x12c   :  { %v346_v51 = vadd.f32 1.0, %v2859_v50  ;;  %v2861_v52 = vpop.eup %2860 }
 0x12d   :  { %v441_v53 = vadd.f32 1.0, %v2861_v52 }
 0x12e   :  { %447 = vrot.lane.b32.xlu0 %v2857_v47, %s3062_s4  ;;  %2862 = vrcp.f32 %v346_v51 }
 0x12f   :  { %2864 = vrcp.f32 %v441_v53 }
 0x138   :  { %v2863_v54 = vpop.eup %2862 }
 0x139   :  { %v2865_v57 = vpop.eup %2864  ;;  %v350_v60 = vmul.f32 0.0, %v2863_v54 }
 0x13a   :  { %v445_v63 = vmul.f32 0.0, %v2865_v57 }
 0x19c   :  { %v353_v55 = vpop.permute.xlu0 %352 }
 0x19d   :  { %v355_v56 = vmul.f32 %v2863_v54, %v353_v55 }
 0x19f   :  { %357 = vrot.lane.b32.xlu1 %v355_v56, %s3063_s21 }
 0x1a0   :  { %v448_v58 = vpop.permute.xlu0 %447 }
 0x1a1   :  { %v450_v59 = vmul.f32 %v2865_v57, %v448_v58 }
 0x1a3   :  { %452 = vrot.lane.b32.xlu1 %v450_v59, %s3063_s21 }
 0x211   :  { %v358_v61 = vpop.permute.xlu1 %357 }
 0x212   :  { %v3249_v62 = vadd.f32 %v358_v61, %v350_v60 }
 0x214   :  { %2866 = vtanh.f32 %v3249_v62  ;;  %v549_v42 = vrot.slane %v3249_v62, 6 }
 0x215   :  { %v453_v0 = vpop.permute.xlu1 %452 }
 0x216   :  { %v3252_v1 = vadd.f32 %v453_v0, %v445_v63 }
 0x218   :  { %2868 = vtanh.f32 %v3252_v1  ;;  %v655_v45 = vrot.slane %v3252_v1, 6 }
 0x21e   :  { %v2867_v2 = vpop.eup %2866 }
 0x21f   :  { %363 = vrot.lane.b32.xlu0 %v2867_v2, %s3062_s4 }
 0x222   :  { %v2869_v3 = vpop.eup %2868 }
 0x223   :  { %458 = vrot.lane.b32.xlu1 %v2869_v3, %s3062_s4 }
 0x291   :  { %v364_v4 = vpop.permute.xlu0 %363 }
 0x292   :  { %v366_v5 = vmul.f32 %v2863_v54, %v364_v4 }
 0x294   :  { %463 = vrot.lane.b32.xlu0 %v366_v5, %s3063_s21 }
 0x295   :  { %v459_v6 = vpop.permute.xlu1 %458 }
 0x296   :  { %v461_v7 = vmul.f32 %v2865_v57, %v459_v6 }
 0x298   :  { %569 = vrot.lane.b32.xlu1 %v461_v7, %s3063_s21 }
 0x306   :  { %v3259_v8 = vpop.permute.xlu0 %463 }
 0x307   :  { %2520 = vmatmul.mubr.msk.f32.vlgmr.msra.gmra.mrb[4].mxu0 %vm98_vm0, %v3259_v8 }
 0x308   :  { %2707 = vmatpush3.bf16.msra.mxu0 %v3188_v19  ;;  %2541 = vmatprep.mubr.msk.f32.mxu0 %vm3060_vm1, %v3061_v29 }
 0x309   :  { %2708 = vmatprep.subr.bf16.mxu0 %v3059_v20 }
 0x30a   :  { %v3267_v9 = vpop.permute.xlu1 %569 }
 0x30b   :  { %2531 = vmatmul.mubr.msk.f32.vlgmr.msra.gmra.mrb[4].mxu1 %vm98_vm0, %v3267_v9 }
 0x30c   :  { %2710 = vmatpush3.bf16.msra.mxu0 %v3200_v27  ;;  %2713 = vmatpush3.bf16.msra.mxu1 %v3194_v22 }
 0x30d   :  { %2714 = vmatprep.subr.bf16.mxu1 %v3059_v20  ;;  %2552 = vmatprep.mubr.msk.f32.mxu1 %vm3060_vm1, %v3061_v29 }
 0x30e   :  { %2717 = vmatprep.subr.bf16.mxu0 %v3059_v20 }
 0x310   :  { %2716 = vmatpush3.bf16.msra.mxu1 %v3204_v28 }
 0x311   :  { %2723 = vmatprep.subr.bf16.mxu1 %v3059_v20 }
 0x3da   :  { %v533_v10 = vpop.f32.mrb[4].mxu0 }
 0x3db   :  { %v538_v11 = vrot.slane %v533_v10, 6  ;;  %v2521_v12 = vpop.f32.mrb[5].mxu0 }
 0x3dd   :  { %v540_v13 = vadd.f32 %v538_v11, %v3239_v38 }
 0x3de   :  { %v639_v14 = vpop.f32.mrb[4].mxu1 }
 0x3df   :  { %2870 = vtanh.f32 %v540_v13  ;;  %v644_v15 = vrot.slane %v639_v14, 6  ;;  %v2532_v16 = vpop.f32.mrb[5].mxu1  ;;  %v2272_v23 = vmul.f32 -1.442695, %v540_v13 }
 0x3e1   :  { %v646_v17 = vadd.f32 %v644_v15, %v3241_v39 }
 0x3e3   :  { %2872 = vtanh.f32 %v646_v17  ;;  %v2274_v24 = vmul.f32 -1.442695, %v646_v17 }
 0x3e4   :  { %2874 = vpow2.f32 %v2272_v23 }
 0x3e5   :  { %2876 = vpow2.f32 %v2274_v24 }
 0x3e9   :  { %v2871_v18 = vpop.eup %2870 }
 0x3ea   :  { %553 = vrot.lane.b32.xlu0 %v2871_v18, %s3062_s4 }
 0x3ed   :  { %v2873_v21 = vpop.eup %2872 }
 0x3ee   :  { %659 = vrot.lane.b32.xlu1 %v2873_v21, %s3062_s4  ;;  %v2875_v25 = vpop.eup %2874 }
 0x3ef   :  { %v544_v26 = vadd.f32 1.0, %v2875_v25  ;;  %v2877_v30 = vpop.eup %2876 }
 0x3f0   :  { %v650_v31 = vadd.f32 1.0, %v2877_v30 }
 0x3f1   :  { %2878 = vrcp.f32 %v544_v26 }
 0x3f2   :  { %2880 = vrcp.f32 %v650_v31 }
 0x3fb   :  { %v2879_v32 = vpop.eup %2878 }
 0x3fc   :  { %v2881_v37 = vpop.eup %2880  ;;  %v551_v43 = vmul.f32 %v2879_v32, %v549_v42 }
 0x3fd   :  { %v657_v47 = vmul.f32 %v2881_v37, %v655_v45 }
 0x45c   :  { %v554_v34 = vpop.permute.xlu0 %553 }
 0x45d   :  { %v556_v35 = vmul.f32 %v2879_v32, %v554_v34 }
 0x45f   :  { %558 = vrot.lane.b32.xlu0 %v556_v35, %s3063_s21 }
 0x460   :  { %v660_v40 = vpop.permute.xlu1 %659 }
 0x461   :  { %v662_v41 = vmul.f32 %v2881_v37, %v660_v40 }
 0x463   :  { %664 = vrot.lane.b32.xlu1 %v662_v41, %s3063_s21 }
 0x4d1   :  { %v559_v44 = vpop.permute.xlu0 %558 }
 0x4d2   :  { %v3287_v46 = vadd.f32 %v559_v44, %v551_v43 }
 0x4d4   :  { %2882 = vtanh.f32 %v3287_v46  ;;  %v762_v23 = vrot.slane %v3287_v46, 6 }
 0x4d5   :  { %v665_v48 = vpop.permute.xlu1 %664 }
 0x4d6   :  { %v3290_v49 = vadd.f32 %v665_v48, %v657_v47 }
 0x4d8   :  { %2884 = vtanh.f32 %v3290_v49  ;;  %v869_v26 = vrot.slane %v3290_v49, 6 }
 0x4de   :  { %v2883_v50 = vpop.eup %2882 }
 0x4df   :  { %564 = vrot.lane.b32.xlu0 %v2883_v50, %s3062_s4 }
 0x4e2   :  { %v2885_v51 = vpop.eup %2884 }
 0x4e3   :  { %670 = vrot.lane.b32.xlu1 %v2885_v51, %s3062_s4 }
 0x551   :  { %v565_v52 = vpop.permute.xlu0 %564 }
 0x552   :  { %v3295_v53 = vmul.f32 %v2879_v32, %v565_v52 }
 0x554   :  { %v675_v54 = vrot.slane %v3295_v53, 2 }
 0x555   :  { %v671_v55 = vpop.permute.xlu1 %670 }
 0x556   :  { %v3298_v56 = vmul.f32 %v2881_v37, %v671_v55  ;;  %676 = vrot.lane.b32.xlu0 %v675_v54, %s3063_s21 }
 0x558   :  { %v782_v57 = vrot.slane %v3298_v56, 2  ;;  %v2048_v56 = vld [vmem:[#allocation4 + $0xb8] sm:$0xff] }
 0x55a   :  { %783 = vrot.lane.b32.xlu1 %v782_v57, %s3063_s21 }
 0x5c8   :  { %v677_v58 = vpop.permute.xlu0 %676 }
 0x5c9   :  { %2542 = vmatmul.mubr.msk.f32.vlgmr.msra.gmra.mrb[6].mxu0 %vm98_vm0, %v677_v58 }
 0x5ca   :  { %2719 = vmatpush3.bf16.msra.mxu0 %v3188_v19  ;;  %2563 = vmatprep.mubr.msk.f32.mxu0 %vm3060_vm1, %v3061_v29 }
 0x5cb   :  { %2720 = vmatprep.subr.bf16.mxu0 %v3059_v20 }
 0x5cc   :  { %v784_v59 = vpop.permute.xlu1 %783 }
 0x5cd   :  { %2553 = vmatmul.mubr.msk.f32.vlgmr.msra.gmra.mrb[6].mxu1 %vm98_vm0, %v784_v59 }
 0x5ce   :  { %2722 = vmatpush3.bf16.msra.mxu0 %v3200_v27  ;;  %2725 = vmatpush3.bf16.msra.mxu1 %v3194_v22 }
 0x5cf   :  { %2726 = vmatprep.subr.bf16.mxu1 %v3059_v20  ;;  %2574 = vmatprep.mubr.msk.f32.mxu1 %vm3060_vm1, %v3061_v29 }
 0x5d0   :  { %2729 = vmatprep.subr.bf16.mxu0 %v3059_v20 }
 0x5d2   :  { %2728 = vmatpush3.bf16.msra.mxu1 %v3204_v28 }
 0x5d3   :  { %2735 = vmatprep.subr.bf16.mxu1 %v3059_v20 }
 0x69c   :  { %v746_v60 = vpop.f32.mrb[6].mxu0 }
 0x69d   :  { %v751_v61 = vrot.slane %v746_v60, 4  ;;  %v2543_v62 = vpop.f32.mrb[7].mxu0 }
 0x69f   :  { %v753_v63 = vadd.f32 %v751_v61, %v3239_v38 }
 0x6a0   :  { %v853_v0 = vpop.f32.mrb[6].mxu1 }
 0x6a1   :  { %2886 = vtanh.f32 %v753_v63  ;;  %v858_v1 = vrot.slane %v853_v0, 4  ;;  %v2554_v2 = vpop.f32.mrb[7].mxu1  ;;  %v2276_v6 = vmul.f32 -1.442695, %v753_v63 }
 0x6a3   :  { %v860_v3 = vadd.f32 %v858_v1, %v3241_v39 }
 0x6a5   :  { %2888 = vtanh.f32 %v860_v3  ;;  %v2278_v7 = vmul.f32 -1.442695, %v860_v3 }
 0x6a6   :  { %2890 = vpow2.f32 %v2276_v6 }
 0x6a7   :  { %2892 = vpow2.f32 %v2278_v7 }
 0x6ab   :  { %v2887_v4 = vpop.eup %2886 }
 0x6ac   :  { %766 = vrot.lane.b32.xlu0 %v2887_v4, %s3062_s4 }
 0x6af   :  { %v2889_v5 = vpop.eup %2888 }
 0x6b0   :  { %873 = vrot.lane.b32.xlu1 %v2889_v5, %s3062_s4  ;;  %v2891_v10 = vpop.eup %2890 }
 0x6b1   :  { %v757_v11 = vadd.f32 1.0, %v2891_v10  ;;  %v2893_v12 = vpop.eup %2892 }
 0x6b2   :  { %v864_v13 = vadd.f32 1.0, %v2893_v12 }
 0x6b3   :  { %2894 = vrcp.f32 %v757_v11 }
 0x6b4   :  { %2896 = vrcp.f32 %v864_v13 }
 0x6bd   :  { %v2895_v14 = vpop.eup %2894 }
 0x6be   :  { %v2897_v17 = vpop.eup %2896  ;;  %v764_v24 = vmul.f32 %v2895_v14, %v762_v23 }
 0x6bf   :  { %v871_v31 = vmul.f32 %v2897_v17, %v869_v26 }
 0x71e   :  { %v767_v15 = vpop.permute.xlu0 %766 }
 0x71f   :  { %v769_v16 = vmul.f32 %v2895_v14, %v767_v15 }
 0x721   :  { %771 = vrot.lane.b32.xlu0 %v769_v16, %s3063_s21 }
 0x722   :  { %v874_v18 = vpop.permute.xlu1 %873 }
 0x723   :  { %v876_v21 = vmul.f32 %v2897_v17, %v874_v18 }
 0x725   :  { %878 = vrot.lane.b32.xlu1 %v876_v21, %s3063_s21 }
 0x793   :  { %v772_v25 = vpop.permute.xlu0 %771 }
 0x794   :  { %v3329_v30 = vadd.f32 %v772_v25, %v764_v24 }
 0x796   :  { %2898 = vtanh.f32 %v3329_v30  ;;  %v976_v10 = vrot.slane %v3329_v30, 6 }
 0x797   :  { %v879_v32 = vpop.permute.xlu1 %878 }
 0x798   :  { %v3332_v34 = vadd.f32 %v879_v32, %v871_v31 }
 0x79a   :  { %2900 = vtanh.f32 %v3332_v34  ;;  %v1083_v13 = vrot.slane %v3332_v34, 6 }
 0x7a0   :  { %v2899_v35 = vpop.eup %2898 }
 0x7a1   :  { %777 = vrot.lane.b32.xlu0 %v2899_v35, %s3062_s4 }
 0x7a4   :  { %v2901_v37 = vpop.eup %2900 }
 0x7a5   :  { %884 = vrot.lane.b32.xlu1 %v2901_v37, %s3062_s4 }
 0x813   :  { %v778_v40 = vpop.permute.xlu0 %777 }
 0x814   :  { %v3337_v41 = vmul.f32 %v2895_v14, %v778_v40 }
 0x816   :  { %v889_v42 = vrot.slane %v3337_v41, 4 }
 0x817   :  { %v885_v43 = vpop.permute.xlu1 %884 }
 0x818   :  { %v3340_v44 = vmul.f32 %v2897_v17, %v885_v43  ;;  %890 = vrot.lane.b32.xlu0 %v889_v42, %s3063_s21 }
 0x81a   :  { %v996_v45 = vrot.slane %v3340_v44, 4 }
 0x81c   :  { %997 = vrot.lane.b32.xlu1 %v996_v45, %s3063_s21 }
 0x88a   :  { %v891_v46 = vpop.permute.xlu0 %890 }
 0x88b   :  { %2564 = vmatmul.mubr.msk.f32.vlgmr.msra.gmra.mrb[8].mxu0 %vm98_vm0, %v891_v46 }
 0x88c   :  { %2731 = vmatpush3.bf16.msra.mxu0 %v3188_v19  ;;  %2585 = vmatprep.mubr.msk.f32.mxu0 %vm3060_vm1, %v3061_v29 }
 0x88d   :  { %2732 = vmatprep.subr.bf16.mxu0 %v3059_v20 }
 0x88e   :  { %v998_v47 = vpop.permute.xlu1 %997 }
 0x88f   :  { %2575 = vmatmul.mubr.msk.f32.vlgmr.msra.gmra.mrb[8].mxu1 %vm98_vm0, %v998_v47 }
 0x890   :  { %2734 = vmatpush3.bf16.msra.mxu0 %v3200_v27  ;;  %2737 = vmatpush3.bf16.msra.mxu1 %v3194_v22 }
 0x891   :  { %2738 = vmatprep.subr.bf16.mxu1 %v3059_v20  ;;  %2596 = vmatprep.mubr.msk.f32.mxu1 %vm3060_vm1, %v3061_v29 }
 0x892   :  { %2741 = vmatprep.subr.bf16.mxu0 %v3059_v20 }
 0x894   :  { %2740 = vmatpush3.bf16.msra.mxu1 %v3204_v28 }
 0x895   :  { %2747 = vmatprep.subr.bf16.mxu1 %v3059_v20 }
 0x95e   :  { %v960_v48 = vpop.f32.mrb[8].mxu0 }
 0x95f   :  { %v965_v49 = vrot.slane %v960_v48, 2  ;;  %v2565_v50 = vpop.f32.mrb[9].mxu0 }
 0x961   :  { %v967_v51 = vadd.f32 %v965_v49, %v3239_v38 }
 0x962   :  { %v1067_v52 = vpop.f32.mrb[8].mxu1 }
 0x963   :  { %2902 = vtanh.f32 %v967_v51  ;;  %v1072_v55 = vrot.slane %v1067_v52, 2  ;;  %v2576_v58 = vpop.f32.mrb[9].mxu1  ;;  %v2280_v62 = vmul.f32 -1.442695, %v967_v51 }
 0x965   :  { %v1074_v59 = vadd.f32 %v1072_v55, %v3241_v39 }
 0x967   :  { %2904 = vtanh.f32 %v1074_v59  ;;  %v2282_v63 = vmul.f32 -1.442695, %v1074_v59 }
 0x968   :  { %2906 = vpow2.f32 %v2280_v62 }
 0x969   :  { %2908 = vpow2.f32 %v2282_v63 }
 0x96d   :  { %v2903_v60 = vpop.eup %2902 }
 0x96e   :  { %980 = vrot.lane.b32.xlu0 %v2903_v60, %s3062_s4 }
 0x971   :  { %v2905_v61 = vpop.eup %2904 }
 0x972   :  { %1087 = vrot.lane.b32.xlu1 %v2905_v61, %s3062_s4  ;;  %v2907_v0 = vpop.eup %2906 }
 0x973   :  { %v971_v1 = vadd.f32 1.0, %v2907_v0  ;;  %v2909_v38 = vpop.eup %2908 }
 0x974   :  { %v1078_v2 = vadd.f32 1.0, %v2909_v38 }
 0x975   :  { %2910 = vrcp.f32 %v971_v1 }
 0x976   :  { %2912 = vrcp.f32 %v1078_v2 }
 0x97f   :  { %v2911_v3 = vpop.eup %2910 }
 0x980   :  { %v2913_v5 = vpop.eup %2912  ;;  %v978_v11 = vmul.f32 %v2911_v3, %v976_v10 }
 0x981   :  { %v1085_v15 = vmul.f32 %v2913_v5, %v1083_v13 }
 0x9e0   :  { %v981_v4 = vpop.permute.xlu0 %980 }
 0x9e1   :  { %v983_v39 = vmul.f32 %v2911_v3, %v981_v4 }
 0x9e3   :  { %985 = vrot.lane.b32.xlu0 %v983_v39, %s3063_s21 }
 0x9e4   :  { %v1088_v6 = vpop.permute.xlu1 %1087 }
 0x9e5   :  { %v1090_v7 = vmul.f32 %v2913_v5, %v1088_v6 }
 0x9e7   :  { %1092 = vrot.lane.b32.xlu1 %v1090_v7, %s3063_s21 }
 0xa55   :  { %v986_v12 = vpop.permute.xlu0 %985 }
 0xa56   :  { %v3371_v14 = vadd.f32 %v986_v12, %v978_v11 }
 0xa58   :  { %2914 = vtanh.f32 %v3371_v14  ;;  %v1187_v38 = vrot.slane %v3371_v14, 6 }
 0xa59   :  { %v1093_v16 = vpop.permute.xlu1 %1092 }
 0xa5a   :  { %v3374_v17 = vadd.f32 %v1093_v16, %v1085_v15 }
 0xa5c   :  { %2916 = vtanh.f32 %v3374_v17  ;;  %v1291_v4 = vrot.slane %v3374_v17, 6 }
 0xa62   :  { %v2915_v18 = vpop.eup %2914 }
 0xa63   :  { %991 = vrot.lane.b32.xlu0 %v2915_v18, %s3062_s4 }
 0xa66   :  { %v2917_v21 = vpop.eup %2916 }
 0xa67   :  { %1098 = vrot.lane.b32.xlu1 %v2917_v21, %s3062_s4 }
 0xad5   :  { %v992_v23 = vpop.permute.xlu0 %991 }
 0xad6   :  { %v3379_v24 = vmul.f32 %v2911_v3, %v992_v23 }
 0xad8   :  { %v1103_v25 = vrot.slane %v3379_v24, 6 }
 0xad9   :  { %v1099_v26 = vpop.permute.xlu1 %1098 }
 0xada   :  { %v3382_v30 = vmul.f32 %v2913_v5, %v1099_v26  ;;  %1104 = vrot.lane.b32.xlu0 %v1103_v25, %s3063_s21 }
 0xadc   :  { %v1207_v31 = vrot.slane %v3382_v30, 6 }
 0xade   :  { %1208 = vrot.lane.b32.xlu1 %v1207_v31, %s3063_s21 }
 0xb4c   :  { %v1105_v32 = vpop.permute.xlu0 %1104 }
 0xb4d   :  { %2586 = vmatmul.mubr.msk.f32.vlgmr.msra.gmra.mrb[10].mxu0 %vm98_vm0, %v1105_v32 }
 0xb4e   :  { %2743 = vmatpush3.bf16.msra.mxu0 %v3188_v19  ;;  %2607 = vmatprep.mubr.msk.f32.mxu0 %vm3060_vm1, %v3061_v29 }
 0xb4f   :  { %2744 = vmatprep.subr.bf16.mxu0 %v3059_v20 }
 0xb50   :  { %v1209_v34 = vpop.permute.xlu1 %1208 }
 0xb51   :  { %2597 = vmatmul.mubr.msk.f32.vlgmr.msra.gmra.mrb[10].mxu1 %vm98_vm0, %v1209_v34 }
 0xb52   :  { %2746 = vmatpush3.bf16.msra.mxu0 %v3200_v27  ;;  %2749 = vmatpush3.bf16.msra.mxu1 %v3194_v22 }
 0xb53   :  { %2750 = vmatprep.subr.bf16.mxu1 %v3059_v20  ;;  %2618 = vmatprep.mubr.msk.f32.mxu1 %vm3060_vm1, %v3061_v29 }
 0xb54   :  { %2753 = vmatprep.subr.bf16.mxu0 %v3059_v20 }
 0xb56   :  { %2752 = vmatpush3.bf16.msra.mxu1 %v3204_v28 }
 0xb57   :  { %2759 = vmatprep.subr.bf16.mxu1 %v3059_v20 }
 0xc20   :  { %v1174_v35 = vpop.f32.mrb[10].mxu0 }
 0xc21   :  { %v1178_v37 = vadd.f32 %v1174_v35, %v3235_v33  ;;  %v2587_v40 = vpop.f32.mrb[11].mxu0 }
 0xc23   :  { %2918 = vtanh.f32 %v1178_v37  ;;  %v2284_v50 = vmul.f32 -1.442695, %v1178_v37 }
 0xc24   :  { %v1278_v43 = vpop.f32.mrb[10].mxu1 }
 0xc25   :  { %v1282_v46 = vadd.f32 %v1278_v43, %v3237_v36  ;;  %v2598_v47 = vpop.f32.mrb[11].mxu1 }
 0xc27   :  { %2920 = vtanh.f32 %v1282_v46  ;;  %v2286_v51 = vmul.f32 -1.442695, %v1282_v46 }
 0xc28   :  { %2922 = vpow2.f32 %v2284_v50 }
 0xc29   :  { %2924 = vpow2.f32 %v2286_v51 }
 0xc2d   :  { %v2919_v48 = vpop.eup %2918 }
 0xc2e   :  { %1191 = vrot.lane.b32.xlu0 %v2919_v48, %s3062_s4 }
 0xc31   :  { %v2921_v49 = vpop.eup %2920 }
 0xc32   :  { %1295 = vrot.lane.b32.xlu1 %v2921_v49, %s3062_s4  ;;  %v2923_v52 = vpop.eup %2922 }
 0xc33   :  { %v1182_v55 = vadd.f32 1.0, %v2923_v52  ;;  %v2925_v58 = vpop.eup %2924 }
 0xc34   :  { %v1286_v59 = vadd.f32 1.0, %v2925_v58 }
 0xc35   :  { %2926 = vrcp.f32 %v1182_v55 }
 0xc36   :  { %2928 = vrcp.f32 %v1286_v59 }
 0xc3f   :  { %v2927_v60 = vpop.eup %2926 }
 0xc40   :  { %v2929_v63 = vpop.eup %2928  ;;  %v1189_v2 = vmul.f32 %v2927_v60, %v1187_v38 }
 0xc41   :  { %v1293_v5 = vmul.f32 %v2929_v63, %v1291_v4 }
 0xca0   :  { %v1192_v61 = vpop.permute.xlu0 %1191 }
 0xca1   :  { %v1194_v62 = vmul.f32 %v2927_v60, %v1192_v61 }
 0xca3   :  { %1196 = vrot.lane.b32.xlu0 %v1194_v62, %s3063_s21 }
 0xca4   :  { %v1296_v0 = vpop.permute.xlu1 %1295 }
 0xca5   :  { %v1298_v1 = vmul.f32 %v2929_v63, %v1296_v0 }
 0xca7   :  { %1300 = vrot.lane.b32.xlu1 %v1298_v1, %s3063_s21 }
 0xd15   :  { %v1197_v3 = vpop.permute.xlu0 %1196 }
 0xd16   :  { %v3413_v39 = vadd.f32 %v1197_v3, %v1189_v2 }
 0xd18   :  { %2930 = vtanh.f32 %v3413_v39  ;;  %v1397_v62 = vrot.slane %v3413_v39, 6 }
 0xd19   :  { %v1301_v6 = vpop.permute.xlu1 %1300 }
 0xd1a   :  { %v3416_v7 = vadd.f32 %v1301_v6, %v1293_v5 }
 0xd1c   :  { %2932 = vtanh.f32 %v3416_v7  ;;  %v1503_v1 = vrot.slane %v3416_v7, 6 }
 0xd22   :  { %v2931_v10 = vpop.eup %2930 }
 0xd23   :  { %1202 = vrot.lane.b32.xlu0 %v2931_v10, %s3062_s4 }
 0xd26   :  { %v2933_v11 = vpop.eup %2932 }
 0xd27   :  { %1306 = vrot.lane.b32.xlu1 %v2933_v11, %s3062_s4 }
 0xd95   :  { %v1203_v12 = vpop.permute.xlu0 %1202 }
 0xd96   :  { %v1205_v13 = vmul.f32 %v2927_v60, %v1203_v12 }
 0xd98   :  { %1311 = vrot.lane.b32.xlu0 %v1205_v13, %s3063_s21 }
 0xd99   :  { %v1307_v14 = vpop.permute.xlu1 %1306 }
 0xd9a   :  { %v1309_v15 = vmul.f32 %v2929_v63, %v1307_v14 }
 0xd9c   :  { %1417 = vrot.lane.b32.xlu1 %v1309_v15, %s3063_s21 }
 0xe0a   :  { %v3423_v16 = vpop.permute.xlu0 %1311 }
 0xe0b   :  { %2608 = vmatmul.mubr.msk.f32.vlgmr.msra.gmra.mrb[12].mxu0 %vm98_vm0, %v3423_v16 }
 0xe0c   :  { %2755 = vmatpush3.bf16.msra.mxu0 %v3188_v19  ;;  %2629 = vmatprep.mubr.msk.f32.mxu0 %vm3060_vm1, %v3061_v29 }
 0xe0d   :  { %2756 = vmatprep.subr.bf16.mxu0 %v3059_v20 }
 0xe0e   :  { %v3431_v17 = vpop.permute.xlu1 %1417 }
 0xe0f   :  { %2619 = vmatmul.mubr.msk.f32.vlgmr.msra.gmra.mrb[12].mxu1 %vm98_vm0, %v3431_v17 }
 0xe10   :  { %2758 = vmatpush3.bf16.msra.mxu0 %v3200_v27  ;;  %2761 = vmatpush3.bf16.msra.mxu1 %v3194_v22 }
 0xe11   :  { %2762 = vmatprep.subr.bf16.mxu1 %v3059_v20  ;;  %2640 = vmatprep.mubr.msk.f32.mxu1 %vm3060_vm1, %v3061_v29 }
 0xe12   :  { %2765 = vmatprep.subr.bf16.mxu0 %v3059_v20 }
 0xe14   :  { %2764 = vmatpush3.bf16.msra.mxu1 %v3204_v28 }
 0xe15   :  { %2771 = vmatprep.subr.bf16.mxu1 %v3059_v20 }
 0xede   :  { %v1381_v18 = vpop.f32.mrb[12].mxu0 }
 0xedf   :  { %v1386_v21 = vrot.slane %v1381_v18, 6  ;;  %v2609_v23 = vpop.f32.mrb[13].mxu0 }
 0xee1   :  { %v1388_v26 = vadd.f32 %v1386_v21, %v3235_v33 }
 0xee2   :  { %v1487_v32 = vpop.f32.mrb[12].mxu1 }
 0xee3   :  { %2934 = vtanh.f32 %v1388_v26  ;;  %v1492_v34 = vrot.slane %v1487_v32, 6  ;;  %v2620_v35 = vpop.f32.mrb[13].mxu1  ;;  %v2288_v46 = vmul.f32 -1.442695, %v1388_v26 }
 0xee5   :  { %v1494_v37 = vadd.f32 %v1492_v34, %v3237_v36 }
 0xee7   :  { %2936 = vtanh.f32 %v1494_v37  ;;  %v2290_v47 = vmul.f32 -1.442695, %v1494_v37 }
 0xee8   :  { %2938 = vpow2.f32 %v2288_v46 }
 0xee9   :  { %2940 = vpow2.f32 %v2290_v47 }
 0xeed   :  { %v2935_v40 = vpop.eup %2934 }
 0xeee   :  { %1401 = vrot.lane.b32.xlu0 %v2935_v40, %s3062_s4 }
 0xef1   :  { %v2937_v43 = vpop.eup %2936 }
 0xef2   :  { %1507 = vrot.lane.b32.xlu1 %v2937_v43, %s3062_s4  ;;  %v2939_v48 = vpop.eup %2938 }
 0xef3   :  { %v1392_v49 = vadd.f32 1.0, %v2939_v48  ;;  %v2941_v50 = vpop.eup %2940 }
 0xef4   :  { %v1498_v51 = vadd.f32 1.0, %v2941_v50 }
 0xef5   :  { %2942 = vrcp.f32 %v1392_v49 }
 0xef6   :  { %2944 = vrcp.f32 %v1498_v51 }
 0xeff   :  { %v2943_v52 = vpop.eup %2942 }
 0xf00   :  { %v2945_v59 = vpop.eup %2944  ;;  %v1399_v63 = vmul.f32 %v2943_v52, %v1397_v62 }
 0xf01   :  { %v1505_v2 = vmul.f32 %v2945_v59, %v1503_v1 }
 0xf60   :  { %v1402_v55 = vpop.permute.xlu0 %1401 }
 0xf61   :  { %v1404_v58 = vmul.f32 %v2943_v52, %v1402_v55 }
 0xf63   :  { %1406 = vrot.lane.b32.xlu0 %v1404_v58, %s3063_s21 }
 0xf64   :  { %v1508_v60 = vpop.permute.xlu1 %1507 }
 0xf65   :  { %v1510_v61 = vmul.f32 %v2945_v59, %v1508_v60 }
 0xf67   :  { %1512 = vrot.lane.b32.xlu1 %v1510_v61, %s3063_s21 }
 0xfd5   :  { %v1407_v0 = vpop.permute.xlu0 %1406 }
 0xfd6   :  { %v3451_v38 = vadd.f32 %v1407_v0, %v1399_v63 }
 0xfd8   :  { %2946 = vtanh.f32 %v3451_v38 }
 0xfd9   :  { %v1513_v3 = vpop.permute.xlu1 %1512 }
 0xfda   :  { %v3454_v4 = vadd.f32 %v1513_v3, %v1505_v2 }
 0xfdc   :  { %2948 = vtanh.f32 %v3454_v4 }
 0xfe2   :  { %v2947_v5 = vpop.eup %2946 }
 0xfe3   :  { %1412 = vrot.lane.b32.xlu0 %v2947_v5, %s3062_s4 }
 0xfe6   :  { %v2949_v6 = vpop.eup %2948 }
 0xfe7   :  { %1518 = vrot.lane.b32.xlu1 %v2949_v6, %s3062_s4 }
0x1055   :  { %v1413_v39 = vpop.permute.xlu0 %1412 }
0x1056   :  { %v3459_v10 = vmul.f32 %v2943_v52, %v1413_v39  ;;  %v1610_v52 = vrot.slane %v3451_v38, 6 }
0x1058   :  { %v1523_v7 = vrot.slane %v3459_v10, 2  ;;  %v2153_v10 = vld [vmem:[#allocation4 + $0x188] sm:$0xff] }
0x1059   :  { %v1519_v11 = vpop.permute.xlu1 %1518 }
0x105a   :  { %v3462_v12 = vmul.f32 %v2945_v59, %v1519_v11  ;;  %1524 = vrot.lane.b32.xlu0 %v1523_v7, %s3063_s21  ;;  %v1717_v59 = vrot.slane %v3454_v4, 6 }
0x105c   :  { %v1630_v13 = vrot.slane %v3462_v12, 2  ;;  %v2028_v12 = vld [vmem:[#allocation4 + $0x18] sm:$0xff] }
0x105e   :  { %1631 = vrot.lane.b32.xlu1 %v1630_v13, %s3063_s21 }
0x10cc   :  { %v1525_v14 = vpop.permute.xlu0 %1524 }
0x10cd   :  { %2630 = vmatmul.mubr.msk.f32.vlgmr.msra.gmra.mrb[14].mxu0 %vm98_vm0, %v1525_v14 }
0x10ce   :  { %2767 = vmatpush3.bf16.msra.mxu0 %v3188_v19  ;;  %2651 = vmatprep.mubr.msk.f32.mxu0 %vm3060_vm1, %v3061_v29 }
0x10cf   :  { %2768 = vmatprep.subr.bf16.mxu0 %v3059_v20 }
0x10d0   :  { %v1632_v15 = vpop.permute.xlu1 %1631 }
0x10d1   :  { %2641 = vmatmul.mubr.msk.f32.vlgmr.msra.gmra.mrb[14].mxu1 %vm98_vm0, %v1632_v15 }
0x10d2   :  { %2770 = vmatpush3.bf16.msra.mxu0 %v3200_v27  ;;  %2773 = vmatpush3.bf16.msra.mxu1 %v3194_v22 }
0x10d3   :  { %2774 = vmatprep.subr.bf16.mxu1 %v3059_v20  ;;  %2662 = vmatprep.mubr.msk.f32.mxu1 %vm3060_vm1, %v3061_v29 }
0x10d6   :  { %2776 = vmatpush3.bf16.msra.mxu1 %v3204_v28 }
0x11a0   :  { %v1594_v19 = vpop.f32.mrb[14].mxu0 }
0x11a1   :  { %v1599_v18 = vrot.slane %v1594_v19, 4  ;;  %v2631_v21 = vpop.f32.mrb[15].mxu0 }
0x11a3   :  { %v1601_v23 = vadd.f32 %v1599_v18, %v3235_v33 }
0x11a4   :  { %v1701_v26 = vpop.f32.mrb[14].mxu1 }
0x11a5   :  { %2950 = vtanh.f32 %v1601_v23  ;;  %v1706_v32 = vrot.slane %v1701_v26, 4  ;;  %v2642_v34 = vpop.f32.mrb[15].mxu1  ;;  %v2292_v29 = vmul.f32 -1.442695, %v1601_v23 }
0x11a7   :  { %v1708_v27 = vadd.f32 %v1706_v32, %v3237_v36 }
0x11a9   :  { %2952 = vtanh.f32 %v1708_v27  ;;  %v2294_v28 = vmul.f32 -1.442695, %v1708_v27 }
0x11aa   :  { %2954 = vpow2.f32 %v2292_v29 }
0x11ab   :  { %2956 = vpow2.f32 %v2294_v28 }
0x11af   :  { %v2951_v22 = vpop.eup %2950 }
0x11b0   :  { %1614 = vrot.lane.b32.xlu0 %v2951_v22, %s3062_s4 }
0x11b3   :  { %v2953_v20 = vpop.eup %2952 }
0x11b4   :  { %1721 = vrot.lane.b32.xlu1 %v2953_v20, %s3062_s4  ;;  %v2955_v35 = vpop.eup %2954 }
0x11b5   :  { %v1605_v37 = vadd.f32 1.0, %v2955_v35  ;;  %v2957_v40 = vpop.eup %2956 }
0x11b6   :  { %v1712_v43 = vadd.f32 1.0, %v2957_v40 }
0x11b7   :  { %2958 = vrcp.f32 %v1605_v37 }
0x11b8   :  { %2960 = vrcp.f32 %v1712_v43 }
0x11c1   :  { %v2959_v46 = vpop.eup %2958 }
0x11c2   :  { %v2961_v49 = vpop.eup %2960  ;;  %v1612_v55 = vmul.f32 %v2959_v46, %v1610_v52  ;;  %v2026_v52 = vld [vmem:[#allocation4 + $0x8] sm:$0xff] }
0x11c3   :  { %v1719_v61 = vmul.f32 %v2961_v49, %v1717_v59 }
0x1222   :  { %v1615_v47 = vpop.permute.xlu0 %1614 }
0x1223   :  { %v1617_v48 = vmul.f32 %v2959_v46, %v1615_v47 }
0x1225   :  { %1619 = vrot.lane.b32.xlu0 %v1617_v48, %s3063_s21  ;;  %v2041_v48 = vld [vmem:[#allocation4 + $0x80] sm:$0xff] }
0x1226   :  { %v1722_v50 = vpop.permute.xlu1 %1721 }
0x1227   :  { %v1724_v51 = vmul.f32 %v2961_v49, %v1722_v50  ;;  %v2025_v50 = vld [vmem:[#allocation4] sm:$0xff] }
0x1228   :  { %v2779_v59 = vpack.c.bf16 %v2026_v52, %v2025_v50  ;;  %v2161_v50 = vld [vmem:[#allocation4 + $0x1c8] sm:$0xff]  ;;  %v2033_v52 = vld [vmem:[#allocation4 + $0x40] sm:$0xff] }
0x1229   :  { %1726 = vrot.lane.b32.xlu1 %v1724_v51, %s3063_s21 }
0x1297   :  { %v1620_v58 = vpop.permute.xlu0 %1619 }
0x1298   :  { %v3491_v60 = vadd.f32 %v1620_v58, %v1612_v55  ;;  %v2043_v55 = vld [vmem:[#allocation4 + $0x90] sm:$0xff]  ;;  %v2044_v58 = vld [vmem:[#allocation4 + $0x98] sm:$0xff] }
0x129a   :  { %2962 = vtanh.f32 %v3491_v60 }
0x129b   :  { %v1727_v62 = vpop.permute.xlu1 %1726 }
0x129c   :  { %v3494_v63 = vadd.f32 %v1727_v62, %v1719_v61  ;;  %v2781_v61 = vpack.c.bf16 %v2044_v58, %v2043_v55  ;;  %v2152_v62 = vld [vmem:[#allocation4 + $0x180] sm:$0xff]  ;;  %v2034_v55 = vld [vmem:[#allocation4 + $0x48] sm:$0xff] }
0x129e   :  { %2964 = vtanh.f32 %v3494_v63 }
0x12a4   :  { %v2963_v0 = vpop.eup %2962 }
0x12a5   :  { %1625 = vrot.lane.b32.xlu0 %v2963_v0, %s3062_s4  ;;  %v2809_v0 = vpack.c.bf16 %v2153_v10, %v2152_v62  ;;  %v2144_v10 = vld [vmem:[#allocation4 + $0x140] sm:$0xff] }
0x12a7   :  { %2810 = vmatprep.subr.bf16.mxu1 %v2809_v0  ;;  %v2162_v0 = vld [vmem:[#allocation4 + $0x1d0] sm:$0xff] }
0x12a8   :  { %v2965_v1 = vpop.eup %2964 }
0x12a9   :  { %1732 = vrot.lane.b32.xlu1 %v2965_v1, %s3062_s4  ;;  %v2137_v1 = vld [vmem:[#allocation4 + $0x108] sm:$0xff] }
0x1317   :  { %v1626_v38 = vpop.permute.xlu0 %1625 }
0x1318   :  { %v3499_v2 = vmul.f32 %v2959_v46, %v1626_v38  ;;  %v2046_v38 = vld [vmem:[#allocation4 + $0xa8] sm:$0xff] }
0x131a   :  { %v1737_v3 = vrot.slane %v3499_v2, 4  ;;  %v2154_v2 = vld [vmem:[#allocation4 + $0x190] sm:$0xff] }
0x131b   :  { %v1733_v4 = vpop.permute.xlu1 %1732 }
0x131c   :  { %v3502_v5 = vmul.f32 %v2961_v49, %v1733_v4  ;;  %1738 = vrot.lane.b32.xlu0 %v1737_v3, %s3063_s21  ;;  %v2042_v49 = vld [vmem:[#allocation4 + $0x88] sm:$0xff] }
0x131d   :  { %v2777_v51 = vpack.c.bf16 %v2042_v49, %v2041_v48  ;;  %v2160_v48 = vld [vmem:[#allocation4 + $0x1c0] sm:$0xff] }
0x131e   :  { %v1844_v6 = vrot.slane %v3502_v5, 4  ;;  %v2142_v5 = vld [vmem:[#allocation4 + $0x130] sm:$0xff]  ;;  %v2825_v62 = vpack.c.bf16 %v2161_v50, %v2160_v48 }
0x131f   :  { %2778 = vmatprep.subr.bf16.mxu0 %v2777_v51 }
0x1320   :  { %1845 = vrot.lane.b32.xlu1 %v1844_v6, %s3063_s21 }
0x138e   :  { %v1739_v39 = vpop.permute.xlu0 %1738 }
0x138f   :  { %2652 = vmatmul.mubr.msk.f32.vlgmr.msra.gmra.mrb[16].mxu0 %vm98_vm0, %v1739_v39  ;;  %v2155_v39 = vld [vmem:[#allocation4 + $0x198] sm:$0xff] }
0x1390   :  { %2780 = vmatpush3.bf16.msra.mxu0 %v2779_v59  ;;  %v2051_v59 = vld [vmem:[#allocation4 + $0xd0] sm:$0xff] }
0x1391   :  { %2782 = vmatprep.subr.bf16.mxu0 %v2781_v61  ;;  %v2052_v61 = vld [vmem:[#allocation4 + $0xd8] sm:$0xff] }
0x1392   :  { %v1846_v11 = vpop.permute.xlu1 %1845 }
0x1393   :  { %2663 = vmatmul.mubr.msk.f32.vlgmr.msra.gmra.mrb[16].mxu1 %vm98_vm0, %v1846_v11  ;;  %v2029_v11 = vld [vmem:[#allocation4 + $0x20] sm:$0xff] }
0x1462   :  { %v1808_v14 = vpop.f32.mrb[16].mxu0 }
0x1463   :  { %v1813_v15 = vrot.slane %v1808_v14, 2  ;;  %v2653_v19 = vpop.f32.mrb[17].mxu0  ;;  %v2030_v14 = vld [vmem:[#allocation4 + $0x28] sm:$0xff] }
0x1464   :  { %v2813_v19 = vpack.c.bf16 %v2155_v39, %v2154_v2  ;;  %v2053_v2 = vld [vmem:[#allocation4 + $0xe0] sm:$0xff] }
0x1465   :  { %v1815_v18 = vadd.f32 %v1813_v15, %v3235_v33 }
0x1466   :  { %v1915_v21 = vpop.f32.mrb[16].mxu1 }
0x1467   :  { %2966 = vtanh.f32 %v1815_v18  ;;  %v1920_v23 = vrot.slane %v1915_v21, 2  ;;  %v2664_v26 = vpop.f32.mrb[17].mxu1  ;;  %v2296_v22 = vmul.f32 -1.442695, %v1815_v18  ;;  %v2138_v18 = vld [vmem:[#allocation4 + $0x110] sm:$0xff] }
0x1468   :  { %v2047_v21 = vld [vmem:[#allocation4 + $0xb0] sm:$0xff]  ;;  %v2157_v26 = vld [vmem:[#allocation4 + $0x1a8] sm:$0xff] }
0x1469   :  { %v1922_v32 = vadd.f32 %v1920_v23, %v3237_v36 }
0x146b   :  { %2968 = vtanh.f32 %v1922_v32  ;;  %v2298_v20 = vmul.f32 -1.442695, %v1922_v32 }
0x146c   :  { %2970 = vpow2.f32 %v2296_v22  ;;  %v2031_v22 = vld [vmem:[#allocation4 + $0x30] sm:$0xff] }
0x146d   :  { %2972 = vpow2.f32 %v2298_v20  ;;  %v2032_v20 = vld [vmem:[#allocation4 + $0x38] sm:$0xff] }
0x146e   :  { %v2791_v49 = vpack.c.bf16 %v2032_v20, %v2031_v22  ;;  %v2056_v22 = vld [vmem:[#allocation4 + $0xf8] sm:$0xff]  ;;  %v2164_v20 = vld [vmem:[#allocation4 + $0x1e0] sm:$0xff] }
0x1471   :  { %v2967_v34 = vpop.eup %2966 }
0x1472   :  { %1828 = vrot.lane.b32.xlu0 %v2967_v34, %s3062_s4  ;;  %v2140_v34 = vld [vmem:[#allocation4 + $0x120] sm:$0xff] }
0x1475   :  { %v2969_v27 = vpop.eup %2968 }
0x1476   :  { %1935 = vrot.lane.b32.xlu1 %v2969_v27, %s3062_s4  ;;  %v2971_v29 = vpop.eup %2970  ;;  %v2787_v27 = vpack.c.bf16 %v2030_v14, %v2029_v11  ;;  %v2146_v11 = vld [vmem:[#allocation4 + $0x150] sm:$0xff]  ;;  %v2147_v14 = vld [vmem:[#allocation4 + $0x158] sm:$0xff] }
0x1477   :  { %v1819_v28 = vadd.f32 1.0, %v2971_v29  ;;  %v2973_v33 = vpop.eup %2972  ;;  %v2141_v29 = vld [vmem:[#allocation4 + $0x128] sm:$0xff] }
0x1478   :  { %v1926_v35 = vadd.f32 1.0, %v2973_v33  ;;  %v2819_v33 = vpack.c.bf16 %v2141_v29, %v2140_v34 }
0x1479   :  { %2974 = vrcp.f32 %v1819_v28  ;;  %v2789_v28 = vpack.c.bf16 %v2048_v56, %v2047_v21  ;;  %v2831_v21 = vpack.c.bf16 %v2147_v14, %v2146_v11  ;;  %v1824_v56 = vrot.slane %v3491_v60, 6  ;;  %v2040_v60 = vld [vmem:[#allocation4 + $0x78] sm:$0xff] }
0x147a   :  { %2976 = vrcp.f32 %v1926_v35  ;;  %v2049_v35 = vld [vmem:[#allocation4 + $0xc0] sm:$0xff] }
0x1483   :  { %v3515_v37 = vpop.eup %2974 }
0x1484   :  { %v3519_v43 = vpop.eup %2976 }
0x14e4   :  { %v1829_v36 = vpop.permute.xlu0 %1828 }
0x14e5   :  { %v1831_v40 = vmul.f32 %v3515_v37, %v1829_v36  ;;  %v2158_v36 = vld [vmem:[#allocation4 + $0x1b0] sm:$0xff] }
0x14e7   :  { %1833 = vrot.lane.b32.xlu0 %v1831_v40, %s3063_s21  ;;  %v2159_v40 = vld [vmem:[#allocation4 + $0x1b8] sm:$0xff] }
0x14e8   :  { %v1936_v46 = vpop.permute.xlu1 %1935 }
0x14e9   :  { %v1938_v47 = vmul.f32 %v3519_v43, %v1936_v46  ;;  %v2050_v46 = vld [vmem:[#allocation4 + $0xc8] sm:$0xff] }
0x14ea   :  { %v2793_v51 = vpack.c.bf16 %v2050_v46, %v2049_v35  ;;  %v2149_v35 = vld [vmem:[#allocation4 + $0x168] sm:$0xff] }
0x14eb   :  { %1940 = vrot.lane.b32.xlu1 %v1938_v47, %s3063_s21  ;;  %1959 = vrot.lane.b32.xlu0 %v1523_v7, %s3062_s4  ;;  %v2027_v7 = vld [vmem:[#allocation4 + $0x10] sm:$0xff]  ;;  %v2821_v47 = vpack.c.bf16 %v2159_v40, %v2158_v36 }
0x14ec   :  { %v2783_v4 = vpack.c.bf16 %v2028_v12, %v2027_v7  ;;  %v2145_v7 = vld [vmem:[#allocation4 + $0x148] sm:$0xff]  ;;  %v2163_v12 = vld [vmem:[#allocation4 + $0x1d8] sm:$0xff] }
0x14ed   :  { %v2829_v39 = vpack.c.bf16 %v2163_v12, %v2162_v0 }
0x14ee   :  { %2784 = vmatpush3.bf16.msra.mxu0 %v2783_v4  ;;  %v2054_v4 = vld [vmem:[#allocation4 + $0xe8] sm:$0xff] }
0x14ef   :  { %1985 = vrot.lane.b32.xlu1 %v1630_v13, %s3062_s4  ;;  %1951 = vrot.lane.b32.xlu0 %v675_v54, %s3062_s4  ;;  %v2136_v13 = vld [vmem:[#allocation4 + $0x100] sm:$0xff] }
0x14f0   :  { %v2811_v53 = vpack.c.bf16 %v2137_v1, %v2136_v13  ;;  %v2045_v54 = vld [vmem:[#allocation4 + $0xa0] sm:$0xff]  ;;  %v2795_v13 = vpack.c.bf16 %v2034_v55, %v2033_v52  ;;  %v2797_v1 = vpack.c.bf16 %v2052_v61, %v2051_v59  ;;  %v2151_v52 = vld [vmem:[#allocation4 + $0x178] sm:$0xff] }
0x14f1   :  { %v2785_v15 = vpack.c.bf16 %v2046_v38, %v2045_v54  ;;  %v2036_v54 = vld [vmem:[#allocation4 + $0x58] sm:$0xff]  ;;  %v2827_v38 = vpack.c.bf16 %v2145_v7, %v2144_v10 }
0x14f2   :  { %2812 = vmatpush3.bf16.msra.mxu1 %v2811_v53  ;;  %v2035_v53 = vld [vmem:[#allocation4 + $0x50] sm:$0xff] }
0x14f3   :  { %1962 = vrot.lane.b32.xlu1 %v1737_v3, %s3064_s22  ;;  %1977 = vrot.lane.b32.xlu0 %v782_v57, %s3062_s4  ;;  %v2139_v3 = vld [vmem:[#allocation4 + $0x118] sm:$0xff]  ;;  %v2156_v57 = vld [vmem:[#allocation4 + $0x1a0] sm:$0xff] }
0x14f4   :  { %v2815_v23 = vpack.c.bf16 %v2139_v3, %v2138_v18  ;;  %2814 = vmatprep.subr.bf16.mxu1 %v2813_v19  ;;  %v2817_v32 = vpack.c.bf16 %v2157_v26, %v2156_v57  ;;  %2786 = vmatprep.subr.bf16.mxu0 %v2785_v15  ;;  %v2799_v15 = vpack.c.bf16 %v2036_v54, %v2035_v53  ;;  %v2037_v18 = vld [vmem:[#allocation4 + $0x60] sm:$0xff]  ;;  %v2038_v3 = vld [vmem:[#allocation4 + $0x68] sm:$0xff] }
0x14f5   :  { %2788 = vmatpush3.bf16.msra.mxu0 %v2787_v27  ;;  %v2801_v19 = vpack.c.bf16 %v2054_v4, %v2053_v2  ;;  %v1826_v57 = vmul.f32 %v3515_v37, %v1824_v56  ;;  %v2055_v27 = vld [vmem:[#allocation4 + $0xf0] sm:$0xff]  ;;  %v2302_v56 = vld [vmem:[#allocation6 + $0x1] ss:$0 sm:$0xff] }
0x14f6   :  { %2816 = vmatpush3.bf16.msra.mxu1 %v2815_v23  ;;  %2790 = vmatprep.subr.bf16.mxu0 %v2789_v28  ;;  %v2803_v23 = vpack.c.bf16 %v2038_v3, %v2037_v18  ;;  %v2805_v29 = vpack.c.bf16 %v2056_v22, %v2055_v27  ;;  %v2165_v28 = vld [vmem:[#allocation4 + $0x1e8] sm:$0xff] }
0x14f7   :  { %1988 = vrot.lane.b32.xlu1 %v1844_v6, %s3064_s22  ;;  %2818 = vmatprep.subr.bf16.mxu1 %v2817_v32  ;;  %v2143_v6 = vld [vmem:[#allocation4 + $0x138] sm:$0xff]  ;;  %v1931_v32 = vrot.slane %v3494_v63, 6  ;;  %v2833_v40 = vpack.c.bf16 %v2165_v28, %v2164_v20  ;;  %v2166_v63 = vld [vmem:[#allocation4 + $0x1f0] sm:$0xff] }
0x14f8   :  { %v2823_v58 = vpack.c.bf16 %v2143_v6, %v2142_v5 }
0x14f9   :  { %2792 = vmatpush3.bf16.msra.mxu0 %v2791_v49  ;;  %v1933_v36 = vmul.f32 %v3519_v43, %v1931_v32  ;;  %v2167_v49 = vld [vmem:[#allocation4 + $0x1f8] sm:$0xff] }
0x14fa   :  { %2820 = vmatpush3.bf16.msra.mxu1 %v2819_v33  ;;  %2794 = vmatprep.subr.bf16.mxu0 %v2793_v51  ;;  %v2148_v33 = vld [vmem:[#allocation4 + $0x160] sm:$0xff]  ;;  %v2837_v50 = vpack.c.bf16 %v2167_v49, %v2166_v63  ;;  %v2150_v51 = vld [vmem:[#allocation4 + $0x170] sm:$0xff] }
0x14fb   :  { %2822 = vmatprep.subr.bf16.mxu1 %v2821_v47  ;;  %v2835_v46 = vpack.c.bf16 %v2149_v35, %v2148_v33  ;;  %v2039_v47 = vld [vmem:[#allocation4 + $0x70] sm:$0xff]  ;;  %v2839_v55 = vpack.c.bf16 %v2151_v52, %v2150_v51 }
0x14fc   :  { %v2807_v6 = vpack.c.bf16 %v2040_v60, %v2039_v47 }
0x14fd   :  { %2796 = vmatpush3.bf16.msra.mxu0 %v2795_v13 }
0x14fe   :  { %2824 = vmatpush3.bf16.msra.mxu1 %v2823_v58  ;;  %2798 = vmatprep.subr.bf16.mxu0 %v2797_v1 }
0x14ff   :  { %2826 = vmatprep.subr.bf16.mxu1 %v2825_v62 }
0x1501   :  { %2800 = vmatpush3.bf16.msra.mxu0 %v2799_v15 }
0x1502   :  { %2828 = vmatpush3.bf16.msra.mxu1 %v2827_v38  ;;  %2802 = vmatprep.subr.bf16.mxu0 %v2801_v19  ;;  %v2301_v19 = vld [vmem:[#allocation6] ss:$0 sm:$0xff] }
0x1503   :  { %2830 = vmatprep.subr.bf16.mxu1 %v2829_v39 }
0x1505   :  { %2804 = vmatpush3.bf16.msra.mxu0 %v2803_v23 }
0x1506   :  { %2832 = vmatpush3.bf16.msra.mxu1 %v2831_v21  ;;  %2806 = vmatprep.subr.bf16.mxu0 %v2805_v29 }
0x1507   :  { %2834 = vmatprep.subr.bf16.mxu1 %v2833_v40 }
0x1509   :  { %2808 = vmatpush3.bf16.msra.mxu0 %v2807_v6 }
0x150a   :  { %2836 = vmatpush3.bf16.msra.mxu1 %v2835_v46 }
0x150b   :  { %2838 = vmatprep.subr.bf16.mxu1 %v2837_v50 }
0x150e   :  { %2840 = vmatpush3.bf16.msra.mxu1 %v2839_v55 }
0x1559   :  { %v1834_v26 = vpop.permute.xlu0 %1833 }
0x155a   :  { %v1836_v34 = vadd.f32 %v1834_v26, %v1826_v57 }
0x155c   :  { %2978 = vtanh.f32 %v1836_v34 }
0x155d   :  { %v1941_v5 = vpop.permute.xlu1 %1940  ;;  %v1960_v61 = vpop.permute.xlu0 %1959 }
0x155e   :  { %v1943_v48 = vadd.f32 %v1941_v5, %v1933_v36  ;;  %v1973_v53 = vsel %vm98_vm0, %v3423_v16, %v1960_v61 }
0x1560   :  { %2980 = vtanh.f32 %v1943_v48 }
0x1561   :  { %v1986_v62 = vpop.permute.xlu1 %1985  ;;  %v1952_v10 = vpop.permute.xlu0 %1951 }
0x1562   :  { %v1997_v16 = vsel %vm98_vm0, %v3431_v17, %v1986_v62 }
0x1565   :  { %v1963_v7 = vpop.permute.xlu1 %1962  ;;  %v1978_v0 = vpop.permute.xlu0 %1977 }
0x1566   :  { %v2979_v58 = vpop.eup %2978  ;;  %v1974_v44 = vsel %vm1969_vm2, %v1973_v53, %v1963_v7  ;;  %v1994_v11 = vsel %vm98_vm0, %v3267_v9, %v1978_v0 }
0x1567   :  { %1839 = vrot.lane.b32.xlu0 %v2979_v58, %s3062_s4 }
0x1569   :  { %v1989_v12 = vpop.permute.xlu1 %1988 }
0x156a   :  { %v2981_v59 = vpop.eup %2980 }
0x156b   :  { %1946 = vrot.lane.b32.xlu1 %v2981_v59, %s3062_s4  ;;  %1954 = vrot.lane.b32.xlu0 %v889_v42, %s3064_s22  ;;  %v1968_v42 = vsel %vm98_vm0, %v3259_v8, %v1952_v10 }
0x156f   :  { %1980 = vrot.lane.b32.xlu1 %v996_v45, %s3064_s22 }
0x15d9   :  { %v1840_v13 = vpop.permute.xlu0 %1839 }
0x15da   :  { %v1842_v1 = vmul.f32 %v3515_v37, %v1840_v13 }
0x15dc   :  { %v1966_v41 = vrot.slane %v1842_v1, 6 }
0x15dd   :  { %v1947_v45 = vpop.permute.xlu1 %1946  ;;  %v1955_v54 = vpop.permute.xlu0 %1954 }
0x15de   :  { %v1949_v38 = vmul.f32 %v3519_v43, %v1947_v45  ;;  %v1970_v2 = vsel %vm1969_vm2, %v1968_v42, %v1955_v54  ;;  %v1975_v4 = vsel %vm1971_vm3, %v1974_v44, %v1966_v41  ;;  %v1998_v43 = vsel %vm1969_vm2, %v1997_v16, %v1989_v12 }
0x15df   :  { %v1972_v37 = vsel %vm1971_vm3, %v1970_v2, %v1103_v25  ;;  %2128 = vmatprep.mubr.f32.mxu0 %v1975_v4 }
0x15e0   :  { %v1992_v39 = vrot.slane %v1949_v38, 6  ;;  %v2002_v8 = vcombine.low %v1972_v37, %v1975_v4  ;;  %2129 = vmatmul.mubr.f32.vlgmr.msra.gmra.mrb[18].mxu0 %v1972_v37 }
0x15e1   :  { %v1981_v14 = vpop.permute.xlu1 %1980 }
0x15e2   :  { %2299 = vst.sshfl [vmem:[%s3592_s7] sm:$0x33 pattern:$0x76325410] %v2002_v8  ;;  %v1995_v24 = vsel %vm1969_vm2, %v1994_v11, %v1981_v14  ;;  %v1999_v25 = vsel %vm1971_vm3, %v1998_v43, %v1992_v39 }
0x15e3   :  { %v1996_v17 = vsel %vm1971_vm3, %v1995_v24, %v1207_v31  ;;  %2240 = vmatprep.mubr.f32.mxu1 %v1999_v25 }
0x15e4   :  { %v2014_v15 = vcombine.low %v1996_v17, %v1999_v25  ;;  %2241 = vmatmul.mubr.f32.vlgmr.msra.gmra.mrb[18].mxu1 %v1996_v17 }
0x15e6   :  { %2304 = vst.sshfl [vmem:[%s3592_s7 + $0x4] sm:$0x33 pattern:$0x76325410] %v2014_v15 }
0x16b3   :  { %v2429_v9 = vpop.f32.mrb[18].mxu0 }
0x16b4   :  { %v2430_v18 = vpop.f32.mrb[19].mxu0 }
0x16b5   :  { %v2431_v3 = vadd.f32 %v2430_v18, %v2429_v9 }
0x16b7   :  { %v2131_v21 = vadd.f32 %v2431_v3, %v2301_v19  ;;  %v2464_v23 = vpop.f32.mrb[18].mxu1 }
0x16b8   :  { %v2465_v57 = vpop.f32.mrb[19].mxu1 }
0x16b9   :  { %2134 = vst [vmem:[%s3593_s8] sm:$0x3] %v2131_v21  ;;  %v2466_v30 = vadd.f32 %v2465_v57, %v2464_v23 }
0x16bb   :  { %v2243_v31 = vadd.f32 %v2466_v30, %v2302_v56 }
0x16bd   :  { %2303 = vst [vmem:[%s3593_s8 + $0x2] sm:$0x3] %v2243_v31 }
0x16be   :  { %2256 = vsyncpa [#allocation3], 1 }
0x16bf   :  { %2257 = vsyncpa [#allocation5], 1 }

</bundles_post_ra>
